<compile_context>
chip_gen: v6e
topology: v6e:2x2x1
jax: 0.10.0
libtpu: 0.0.40
codegen_flags: <defaults>
</compile_context>

<pallas_src>
from functools import partial

import jax
import jax.numpy as jnp
from jax.experimental import pallas as pl
from jax.experimental.pallas import tpu as pltpu

LANES = 128


def _round_up(x, m):
    return (x + m - 1) // m * m


# ----------------------------------------------------------------------------
# Fused Pallas kernel (one grid step == one batch element)
# ----------------------------------------------------------------------------
def _residual_block_kernel(*refs, stride, ksize, Ho, Wo, downsample):
    if downsample:
        (x_ref, w1_ref, b1_ref, w2_ref, b2_ref, wr_ref, br_ref,
         o_ref, out1p_ref) = refs
    else:
        (x_ref, w1_ref, b1_ref, w2_ref, b2_ref, o_ref, out1p_ref) = refs

    s = stride
    M = Ho * Wo
    Cpi = x_ref.shape[-1]
    Cpo = w1_ref.shape[-1]

    def tap(dh, dw):
        # reads x_pad[s*i + dh, s*j + dw, :] for i in [0,Ho), j in [0,Wo)
        # from the phase-decomposed input (all indices static).
        ph = (dh % s) * s + (dw % s)
        r0, c0 = dh // s, dw // s
        return x_ref[ph, r0:r0 + Ho, c0:c0 + Wo, :]

    # ---- conv1 (3x3, stride s, pad 1), BN1 scale folded in w1, +bias, ReLU --
    acc = jnp.zeros((M, Cpo), jnp.float32)
    for dh in range(ksize):
        for dw in range(ksize):
            a = tap(dh, dw).reshape(M, Cpi).astype(jnp.bfloat16)
            acc += jnp.dot(a, w1_ref[dh * ksize + dw],
                           preferred_element_type=jnp.float32)
    out1 = jnp.maximum(acc + b1_ref[...], 0.0)                  # (M, Cpo) f32

    # stage out1 with a zero halo of 1 in VMEM scratch (never hits HBM)
    out1p_ref[...] = jnp.zeros_like(out1p_ref)
    out1p_ref[1:Ho + 1, 1:Wo + 1, :] = out1.reshape(Ho, Wo, Cpo)

    # ---- conv2 (3x3, stride 1, pad 1), BN2 scale folded in w2, +bias --------
    acc = jnp.zeros((M, Cpo), jnp.float32)
    for dh in range(ksize):
        for dw in range(ksize):
            a = out1p_ref[dh:dh + Ho, dw:dw + Wo, :]
            a = a.reshape(M, Cpo).astype(jnp.bfloat16)
            acc += jnp.dot(a, w2_ref[dh * ksize + dw],
                           preferred_element_type=jnp.float32)
    y = acc + b2_ref[...]

    # ---- residual branch ----------------------------------------------------
    # identity / 1x1-stride-s conv both read x_pad[s*i+1, s*j+1, :] == x[s*i, s*j, :]
    xr = tap(1, 1).reshape(M, Cpi)
    if downsample:
        res = jnp.dot(xr.astype(jnp.bfloat16), wr_ref[...],
                      preferred_element_type=jnp.float32) + br_ref[...]
    else:
        res = xr                                                # f32, Cpi == Cpo

    o_ref[...] = jnp.maximum(y + res, 0.0).reshape(Ho, Wo, Cpo).astype(o_ref.dtype)


# ----------------------------------------------------------------------------
# Parameter prep (done once): fold BN, pad channels, bf16-cast weights
# ----------------------------------------------------------------------------
def _fold_bn(gamma, beta, mean, var, eps=1e-5):
    scale = gamma / jnp.sqrt(var + eps)
    return scale, beta - mean * scale


def prepare_block_params(params):
    Cout, Cin = params["w1"].shape[:2]
    Cpi = _round_up(Cin, LANES)
    Cpo = _round_up(Cout, LANES)

    def conv_mat(w_oihw, scale):          # (O,I,kh,kw) -> (kh*kw, Ip, Cpo) bf16
        o, i, kh, kw = w_oihw.shape
        w = w_oihw * scale[:, None, None, None]
        w = jnp.transpose(w, (2, 3, 1, 0)).reshape(kh * kw, i, o)
        w = jnp.pad(w, ((0, 0), (0, _round_up(i, LANES) - i), (0, Cpo - o)))
        return w.astype(jnp.bfloat16)

    def bias_row(b):
        return jnp.pad(b, (0, Cpo - Cout)).reshape(1, Cpo).astype(jnp.float32)

    s1, b1 = _fold_bn(*params["bn1"])
    s2, b2 = _fold_bn(*params["bn2"])
    prep = {
        "w1": conv_mat(params["w1"], s1), "b1": bias_row(b1),
        "w2": conv_mat(params["w2"], s2), "b2": bias_row(b2),
        "Cout": int(Cout),
    }
    if "wr" in params:
        sr, br = _fold_bn(*params["bnr"])
        prep["wr"] = conv_mat(params["wr"], sr)[0]              # (Cpi, Cpo)
        prep["br"] = bias_row(br)
    return prep


# ----------------------------------------------------------------------------
# Forward wrapper
# ----------------------------------------------------------------------------
@partial(jax.jit, static_argnames=("stride", "cout"))
def _forward(x_nchw, w1, b1, w2, b2, wr, br, *, stride, cout):
    N, Cin, H, W = x_nchw.shape
    s, ks, pad = stride, 3, 1
    Cpi, Cpo = w1.shape[1], w1.shape[2]
    downsample = wr is not None

    Ho = (H + 2 * pad - ks) // s + 1
    Wo = (W + 2 * pad - ks) // s + 1
    # TODO(synk): pad W for other sizes; kept as a hard requirement here.
    assert Wo % 8 == 0, "output width must be a multiple of 8 (sublane aligned)"

    # phase-decomposed, spatially padded, channel-padded NHWC input:
    # xph[n, a*s + b, i, j, c] == x_pad[n, s*i + a, s*j + b, c]
    Hph = max(-(-(H + 2 * pad) // s), (ks - 1) // s + Ho)
    Wph = max(-(-(W + 2 * pad) // s), (ks - 1) // s + Wo)
    x = jnp.transpose(x_nchw, (0, 2, 3, 1)).astype(jnp.float32)
    x = jnp.pad(x, ((0, 0),
                    (pad, s * Hph - H - pad),
                    (pad, s * Wph - W - pad),
                    (0, Cpi - Cin)))
    x = x.reshape(N, Hph, s, Wph, s, Cpi)
    x = jnp.transpose(x, (0, 2, 4, 1, 3, 5)).reshape(N, s * s, Hph, Wph, Cpi)

    def full_spec(a):
        return pl.BlockSpec(a.shape, lambda n, nd=a.ndim: (0,) * nd)

    in_specs = [pl.BlockSpec((None, s * s, Hph, Wph, Cpi),
                             lambda n: (n, 0, 0, 0, 0)),
                full_spec(w1), full_spec(b1), full_spec(w2), full_spec(b2)]
    args = [x, w1, b1, w2, b2]
    if downsample:
        in_specs += [full_spec(wr), full_spec(br)]
        args += [wr, br]

    kernel = partial(_residual_block_kernel, stride=s, ksize=ks,
                     Ho=Ho, Wo=Wo, downsample=downsample)

    flops = 2 * N * Ho * Wo * (ks * ks * Cpi * Cpo + ks * ks * Cpo * Cpo
                               + (Cpi * Cpo if downsample else 0))
    bytes_accessed = (int(x.size) * 4
                      + sum(int(a.size) * a.dtype.itemsize for a in args[1:])
                      + N * Ho * Wo * Cpo * 4)
    block_bytes = ((int(x.size) // N) * 4
                   + sum(int(a.size) * a.dtype.itemsize for a in args[1:])
                   + Ho * Wo * Cpo * 4 + (Ho + 2) * (Wo + 2) * Cpo * 4)
    vmem_limit = min(max(4 * block_bytes, 16 * 1024 * 1024), 64 * 1024 * 1024)

    out = pl.pallas_call(
        kernel,
        out_shape=jax.ShapeDtypeStruct((N, Ho, Wo, Cpo), jnp.float32),
        grid=(N,),
        in_specs=in_specs,
        out_specs=pl.BlockSpec((None, Ho, Wo, Cpo), lambda n: (n, 0, 0, 0)),
        scratch_shapes=[pltpu.VMEM((Ho + 2, Wo + 2, Cpo), jnp.float32)],
        compiler_params=pltpu.CompilerParams(
            dimension_semantics=("parallel",),
            vmem_limit_bytes=vmem_limit),
        cost_estimate=pl.CostEstimate(flops=flops, transcendentals=0,
                                      bytes_accessed=bytes_accessed),
    )(*args)

    return jnp.transpose(out[..., :cout], (0, 3, 1, 2))


def residual_block(x_nchw, prep, stride):
    """Forward pass of ResidualBlock (NCHW in / NCHW out)."""
    return _forward(x_nchw, prep["w1"], prep["b1"], prep["w2"], prep["b2"],
                    prep.get("wr"), prep.get("br"),
                    stride=stride, cout=prep["Cout"])


# ----------------------------------------------------------------------------
# Parameters + pure-JAX reference (matches kernel numerics: inference-mode BN
# folded into weights, conv operands rounded to bf16, f32 accumulation)
# ----------------------------------------------------------------------------
def make_params(key, in_channels, out_channels, stride):
    ks = jax.random.split(key, 3)
    p = {
        "w1": 0.1 * jax.random.normal(ks[0], (out_channels, in_channels, 3, 3), jnp.float32),
        "w2": 0.1 * jax.random.normal(ks[1], (out_channels, out_channels, 3, 3), jnp.float32),
        "bn1": (jnp.ones(out_channels) * 1.1, jnp.ones(out_channels) * 0.05,
                jnp.ones(out_channels) * 0.02, jnp.ones(out_channels) * 0.9),
        "bn2": (jnp.ones(out_channels) * 0.95, jnp.ones(out_channels) * -0.03,
                jnp.ones(out_channels) * -0.01, jnp.ones(out_channels) * 1.1),
    }
    if stride != 1 or in_channels != out_channels:
        p["wr"] = 0.1 * jax.random.normal(ks[2], (out_channels, in_channels, 1, 1), jnp.float32)
        p["bnr"] = (jnp.ones(out_channels) * 1.05, jnp.ones(out_channels) * 0.01,
                    jnp.ones(out_channels) * 0.03, jnp.ones(out_channels) * 0.95)
    return p


def _round_bf16(a):
    return a.astype(jnp.bfloat16).astype(jnp.float32)


def residual_block_ref(x, params, stride):
    def conv(xf, w, s, pad):
        return jax.lax.conv_general_dilated(
            _round_bf16(xf), _round_bf16(w), (s, s), [(pad, pad), (pad, pad)],
            dimension_numbers=("NCHW", "OIHW", "NCHW"),
            precision=jax.lax.Precision.HIGHEST)

    s1, b1 = _fold_bn(*params["bn1"])
    s2, b2 = _fold_bn(*params["bn2"])
    out = conv(x, params["w1"] * s1[:, None, None, None], stride, 1)
    out = jnp.maximum(out + b1[None, :, None, None], 0.0)
    out = conv(out, params["w2"] * s2[:, None, None, None], 1, 1)
    out = out + b2[None, :, None, None]
    if "wr" in params:
        sr, br = _fold_bn(*params["bnr"])
        ident = conv(x, params["wr"] * sr[:, None, None, None], stride, 0)
        ident = ident + br[None, :, None, None]
    else:
        ident = x
    return jnp.maximum(out + ident, 0.0)


if __name__ == "__main__":
    key = jax.random.PRNGKey(0)
    kx, kp, kp2 = jax.random.split(key, 3)

    # 1) downsample path: stride 2, channel change (1x1-conv residual branch)
    N, Cin, H, W = 2, 4, 16, 16
    Cout, stride = 8, 2
    x = jax.random.normal(kx, (N, Cin, H, W), jnp.float32)
    params = make_params(kp, Cin, Cout, stride)
    prep = prepare_block_params(params)

    out = jax.block_until_ready(residual_block(x, prep, stride))
    ref = residual_block_ref(x, params, stride)
    assert out.shape == (N, Cout, H // stride, W // stride)
    assert jnp.allclose(out, ref, atol=1e-4, rtol=1e-4), \
        float(jnp.max(jnp.abs(out - ref)))

    # 2) identity path: stride 1, same channel count
    x2 = jax.random.normal(kx, (N, Cout, H, W), jnp.float32)
    params2 = make_params(kp2, Cout, Cout, 1)
    prep2 = prepare_block_params(params2)
    out2 = jax.block_until_ready(residual_block(x2, prep2, 1))
    ref2 = residual_block_ref(x2, params2, 1)
    assert out2.shape == (N, Cout, H, W)
    assert jnp.allclose(out2, ref2, atol=1e-4, rtol=1e-4), \
        float(jnp.max(jnp.abs(out2 - ref2)))

    print("KERNEL_OK")
</pallas_src>

<mosaic_0001>
module attributes {stable_mosaic.version = 11 : i64} {
  func.func @_residual_block_kernel(%arg0: i32, %arg1: memref<1x4x9x9x128xf32, #tpu.memory_space<vmem>>, %arg2: memref<9x128x128xbf16, #tpu.memory_space<vmem>>, %arg3: memref<1x128xf32, #tpu.memory_space<vmem>>, %arg4: memref<9x128x128xbf16, #tpu.memory_space<vmem>>, %arg5: memref<1x128xf32, #tpu.memory_space<vmem>>, %arg6: memref<128x128xbf16, #tpu.memory_space<vmem>>, %arg7: memref<1x128xf32, #tpu.memory_space<vmem>>, %arg8: memref<1x8x8x128xf32, #tpu.memory_space<vmem>>, %arg9: memref<10x10x128xf32, #tpu.memory_space<vmem>>) attributes {dimension_semantics = [#tpu.dimension_semantics<parallel>], iteration_bounds = array<i64: 2>, scalar_prefetch = 0 : i64, scratch_operands = 1 : i64, tpu.core_type = #tpu.core_type<tc>, window_params = [{transform_indices = @transform_0, window_bounds = array<i64: 1, 4, 9, 9, 128>}, {pipeline_mode = #tpu.pipeline_mode<synchronous>, transform_indices = @transform_1, window_bounds = array<i64: 9, 128, 128>}, {pipeline_mode = #tpu.pipeline_mode<synchronous>, transform_indices = @transform_2, window_bounds = array<i64: 1, 128>}, {pipeline_mode = #tpu.pipeline_mode<synchronous>, transform_indices = @transform_3, window_bounds = array<i64: 9, 128, 128>}, {pipeline_mode = #tpu.pipeline_mode<synchronous>, transform_indices = @transform_4, window_bounds = array<i64: 1, 128>}, {pipeline_mode = #tpu.pipeline_mode<synchronous>, transform_indices = @transform_5, window_bounds = array<i64: 128, 128>}, {pipeline_mode = #tpu.pipeline_mode<synchronous>, transform_indices = @transform_6, window_bounds = array<i64: 1, 128>}, {transform_indices = @transform_7, window_bounds = array<i64: 1, 8, 8, 128>}]} {
    %cst = arith.constant 0.000000e+00 : f32
    %0 = vector.broadcast %cst : f32 to vector<64x128xf32>
    %c0 = arith.constant 0 : index
    %c0_0 = arith.constant 0 : index
    %c0_1 = arith.constant 0 : index
    %c0_2 = arith.constant 0 : index
    %c0_3 = arith.constant 0 : index
    %1 = vector.load %arg1[%c0, %c0_0, %c0_1, %c0_2, %c0_3] : memref<1x4x9x9x128xf32, #tpu.memory_space<vmem>>, vector<1x1x8x8x128xf32>
    %2 = vector.shape_cast %1 : vector<1x1x8x8x128xf32> to vector<8x8x128xf32>
    %3 = vector.shape_cast %2 : vector<8x8x128xf32> to vector<64x128xf32>
    %4 = arith.truncf %3 : vector<64x128xf32> to vector<64x128xbf16>
    %c0_4 = arith.constant 0 : index
    %c0_5 = arith.constant 0 : index
    %c0_6 = arith.constant 0 : index
    %5 = vector.load %arg2[%c0_4, %c0_5, %c0_6] : memref<9x128x128xbf16, #tpu.memory_space<vmem>>, vector<1x128x128xbf16>
    %6 = vector.shape_cast %5 : vector<1x128x128xbf16> to vector<128x128xbf16>
    %cst_7 = arith.constant dense<0.000000e+00> : vector<64x128xf32>
    %7 = tpu.matmul %4, %6, %cst_7 {dimension_numbers = #tpu.dot_dimension_numbers<[1], [0], [0], [1], [0, 0, 1, 1], [], []>} : vector<64x128xbf16>, vector<128x128xbf16>, vector<64x128xf32> -> vector<64x128xf32>
    %8 = arith.addf %0, %7 : vector<64x128xf32>
    %c0_8 = arith.constant 0 : index
    %c1 = arith.constant 1 : index
    %c0_9 = arith.constant 0 : index
    %c0_10 = arith.constant 0 : index
    %c0_11 = arith.constant 0 : index
    %9 = vector.load %arg1[%c0_8, %c1, %c0_9, %c0_10, %c0_11] : memref<1x4x9x9x128xf32, #tpu.memory_space<vmem>>, vector<1x1x8x8x128xf32>
    %10 = vector.shape_cast %9 : vector<1x1x8x8x128xf32> to vector<8x8x128xf32>
    %11 = vector.shape_cast %10 : vector<8x8x128xf32> to vector<64x128xf32>
    %12 = arith.truncf %11 : vector<64x128xf32> to vector<64x128xbf16>
    %c1_12 = arith.constant 1 : index
    %c0_13 = arith.constant 0 : index
    %c0_14 = arith.constant 0 : index
    %13 = vector.load %arg2[%c1_12, %c0_13, %c0_14] : memref<9x128x128xbf16, #tpu.memory_space<vmem>>, vector<1x128x128xbf16>
    %14 = vector.shape_cast %13 : vector<1x128x128xbf16> to vector<128x128xbf16>
    %cst_15 = arith.constant dense<0.000000e+00> : vector<64x128xf32>
    %15 = tpu.matmul %12, %14, %cst_15 {dimension_numbers = #tpu.dot_dimension_numbers<[1], [0], [0], [1], [0, 0, 1, 1], [], []>} : vector<64x128xbf16>, vector<128x128xbf16>, vector<64x128xf32> -> vector<64x128xf32>
    %16 = arith.addf %8, %15 : vector<64x128xf32>
    %c0_16 = arith.constant 0 : index
    %c0_17 = arith.constant 0 : index
    %c0_18 = arith.constant 0 : index
    %c1_19 = arith.constant 1 : index
    %c0_20 = arith.constant 0 : index
    %17 = vector.load %arg1[%c0_16, %c0_17, %c0_18, %c1_19, %c0_20] : memref<1x4x9x9x128xf32, #tpu.memory_space<vmem>>, vector<1x1x8x8x128xf32>
    %18 = vector.shape_cast %17 : vector<1x1x8x8x128xf32> to vector<8x8x128xf32>
    %19 = vector.shape_cast %18 : vector<8x8x128xf32> to vector<64x128xf32>
    %20 = arith.truncf %19 : vector<64x128xf32> to vector<64x128xbf16>
    %c2 = arith.constant 2 : index
    %c0_21 = arith.constant 0 : index
    %c0_22 = arith.constant 0 : index
    %21 = vector.load %arg2[%c2, %c0_21, %c0_22] : memref<9x128x128xbf16, #tpu.memory_space<vmem>>, vector<1x128x128xbf16>
    %22 = vector.shape_cast %21 : vector<1x128x128xbf16> to vector<128x128xbf16>
    %cst_23 = arith.constant dense<0.000000e+00> : vector<64x128xf32>
    %23 = tpu.matmul %20, %22, %cst_23 {dimension_numbers = #tpu.dot_dimension_numbers<[1], [0], [0], [1], [0, 0, 1, 1], [], []>} : vector<64x128xbf16>, vector<128x128xbf16>, vector<64x128xf32> -> vector<64x128xf32>
    %24 = arith.addf %16, %23 : vector<64x128xf32>
    %c0_24 = arith.constant 0 : index
    %c2_25 = arith.constant 2 : index
    %c0_26 = arith.constant 0 : index
    %c0_27 = arith.constant 0 : index
    %c0_28 = arith.constant 0 : index
    %25 = vector.load %arg1[%c0_24, %c2_25, %c0_26, %c0_27, %c0_28] : memref<1x4x9x9x128xf32, #tpu.memory_space<vmem>>, vector<1x1x8x8x128xf32>
    %26 = vector.shape_cast %25 : vector<1x1x8x8x128xf32> to vector<8x8x128xf32>
    %27 = vector.shape_cast %26 : vector<8x8x128xf32> to vector<64x128xf32>
    %28 = arith.truncf %27 : vector<64x128xf32> to vector<64x128xbf16>
    %c3 = arith.constant 3 : index
    %c0_29 = arith.constant 0 : index
    %c0_30 = arith.constant 0 : index
    %29 = vector.load %arg2[%c3, %c0_29, %c0_30] : memref<9x128x128xbf16, #tpu.memory_space<vmem>>, vector<1x128x128xbf16>
    %30 = vector.shape_cast %29 : vector<1x128x128xbf16> to vector<128x128xbf16>
    %cst_31 = arith.constant dense<0.000000e+00> : vector<64x128xf32>
    %31 = tpu.matmul %28, %30, %cst_31 {dimension_numbers = #tpu.dot_dimension_numbers<[1], [0], [0], [1], [0, 0, 1, 1], [], []>} : vector<64x128xbf16>, vector<128x128xbf16>, vector<64x128xf32> -> vector<64x128xf32>
    %32 = arith.addf %24, %31 : vector<64x128xf32>
    %c0_32 = arith.constant 0 : index
    %c3_33 = arith.constant 3 : index
    %c0_34 = arith.constant 0 : index
    %c0_35 = arith.constant 0 : index
    %c0_36 = arith.constant 0 : index
    %33 = vector.load %arg1[%c0_32, %c3_33, %c0_34, %c0_35, %c0_36] : memref<1x4x9x9x128xf32, #tpu.memory_space<vmem>>, vector<1x1x8x8x128xf32>
    %34 = vector.shape_cast %33 : vector<1x1x8x8x128xf32> to vector<8x8x128xf32>
    %35 = vector.shape_cast %34 : vector<8x8x128xf32> to vector<64x128xf32>
    %36 = arith.truncf %35 : vector<64x128xf32> to vector<64x128xbf16>
    %c4 = arith.constant 4 : index
    %c0_37 = arith.constant 0 : index
    %c0_38 = arith.constant 0 : index
    %37 = vector.load %arg2[%c4, %c0_37, %c0_38] : memref<9x128x128xbf16, #tpu.memory_space<vmem>>, vector<1x128x128xbf16>
    %38 = vector.shape_cast %37 : vector<1x128x128xbf16> to vector<128x128xbf16>
    %cst_39 = arith.constant dense<0.000000e+00> : vector<64x128xf32>
    %39 = tpu.matmul %36, %38, %cst_39 {dimension_numbers = #tpu.dot_dimension_numbers<[1], [0], [0], [1], [0, 0, 1, 1], [], []>} : vector<64x128xbf16>, vector<128x128xbf16>, vector<64x128xf32> -> vector<64x128xf32>
    %40 = arith.addf %32, %39 : vector<64x128xf32>
    %c0_40 = arith.constant 0 : index
    %c2_41 = arith.constant 2 : index
    %c0_42 = arith.constant 0 : index
    %c1_43 = arith.constant 1 : index
    %c0_44 = arith.constant 0 : index
    %41 = vector.load %arg1[%c0_40, %c2_41, %c0_42, %c1_43, %c0_44] : memref<1x4x9x9x128xf32, #tpu.memory_space<vmem>>, vector<1x1x8x8x128xf32>
    %42 = vector.shape_cast %41 : vector<1x1x8x8x128xf32> to vector<8x8x128xf32>
    %43 = vector.shape_cast %42 : vector<8x8x128xf32> to vector<64x128xf32>
    %44 = arith.truncf %43 : vector<64x128xf32> to vector<64x128xbf16>
    %c5 = arith.constant 5 : index
    %c0_45 = arith.constant 0 : index
    %c0_46 = arith.constant 0 : index
    %45 = vector.load %arg2[%c5, %c0_45, %c0_46] : memref<9x128x128xbf16, #tpu.memory_space<vmem>>, vector<1x128x128xbf16>
    %46 = vector.shape_cast %45 : vector<1x128x128xbf16> to vector<128x128xbf16>
    %cst_47 = arith.constant dense<0.000000e+00> : vector<64x128xf32>
    %47 = tpu.matmul %44, %46, %cst_47 {dimension_numbers = #tpu.dot_dimension_numbers<[1], [0], [0], [1], [0, 0, 1, 1], [], []>} : vector<64x128xbf16>, vector<128x128xbf16>, vector<64x128xf32> -> vector<64x128xf32>
    %48 = arith.addf %40, %47 : vector<64x128xf32>
    %c0_48 = arith.constant 0 : index
    %c0_49 = arith.constant 0 : index
    %c1_50 = arith.constant 1 : index
    %c0_51 = arith.constant 0 : index
    %c0_52 = arith.constant 0 : index
    %49 = vector.load %arg1[%c0_48, %c0_49, %c1_50, %c0_51, %c0_52] : memref<1x4x9x9x128xf32, #tpu.memory_space<vmem>>, vector<1x1x8x8x128xf32>
    %50 = vector.shape_cast %49 : vector<1x1x8x8x128xf32> to vector<8x8x128xf32>
    %51 = vector.shape_cast %50 : vector<8x8x128xf32> to vector<64x128xf32>
    %52 = arith.truncf %51 : vector<64x128xf32> to vector<64x128xbf16>
    %c6 = arith.constant 6 : index
    %c0_53 = arith.constant 0 : index
    %c0_54 = arith.constant 0 : index
    %53 = vector.load %arg2[%c6, %c0_53, %c0_54] : memref<9x128x128xbf16, #tpu.memory_space<vmem>>, vector<1x128x128xbf16>
    %54 = vector.shape_cast %53 : vector<1x128x128xbf16> to vector<128x128xbf16>
    %cst_55 = arith.constant dense<0.000000e+00> : vector<64x128xf32>
    %55 = tpu.matmul %52, %54, %cst_55 {dimension_numbers = #tpu.dot_dimension_numbers<[1], [0], [0], [1], [0, 0, 1, 1], [], []>} : vector<64x128xbf16>, vector<128x128xbf16>, vector<64x128xf32> -> vector<64x128xf32>
    %56 = arith.addf %48, %55 : vector<64x128xf32>
    %c0_56 = arith.constant 0 : index
    %c1_57 = arith.constant 1 : index
    %c1_58 = arith.constant 1 : index
    %c0_59 = arith.constant 0 : index
    %c0_60 = arith.constant 0 : index
    %57 = vector.load %arg1[%c0_56, %c1_57, %c1_58, %c0_59, %c0_60] : memref<1x4x9x9x128xf32, #tpu.memory_space<vmem>>, vector<1x1x8x8x128xf32>
    %58 = vector.shape_cast %57 : vector<1x1x8x8x128xf32> to vector<8x8x128xf32>
    %59 = vector.shape_cast %58 : vector<8x8x128xf32> to vector<64x128xf32>
    %60 = arith.truncf %59 : vector<64x128xf32> to vector<64x128xbf16>
    %c7 = arith.constant 7 : index
    %c0_61 = arith.constant 0 : index
    %c0_62 = arith.constant 0 : index
    %61 = vector.load %arg2[%c7, %c0_61, %c0_62] : memref<9x128x128xbf16, #tpu.memory_space<vmem>>, vector<1x128x128xbf16>
    %62 = vector.shape_cast %61 : vector<1x128x128xbf16> to vector<128x128xbf16>
    %cst_63 = arith.constant dense<0.000000e+00> : vector<64x128xf32>
    %63 = tpu.matmul %60, %62, %cst_63 {dimension_numbers = #tpu.dot_dimension_numbers<[1], [0], [0], [1], [0, 0, 1, 1], [], []>} : vector<64x128xbf16>, vector<128x128xbf16>, vector<64x128xf32> -> vector<64x128xf32>
    %64 = arith.addf %56, %63 : vector<64x128xf32>
    %c0_64 = arith.constant 0 : index
    %c0_65 = arith.constant 0 : index
    %c1_66 = arith.constant 1 : index
    %c1_67 = arith.constant 1 : index
    %c0_68 = arith.constant 0 : index
    %65 = vector.load %arg1[%c0_64, %c0_65, %c1_66, %c1_67, %c0_68] : memref<1x4x9x9x128xf32, #tpu.memory_space<vmem>>, vector<1x1x8x8x128xf32>
    %66 = vector.shape_cast %65 : vector<1x1x8x8x128xf32> to vector<8x8x128xf32>
    %67 = vector.shape_cast %66 : vector<8x8x128xf32> to vector<64x128xf32>
    %68 = arith.truncf %67 : vector<64x128xf32> to vector<64x128xbf16>
    %c8 = arith.constant 8 : index
    %c0_69 = arith.constant 0 : index
    %c0_70 = arith.constant 0 : index
    %69 = vector.load %arg2[%c8, %c0_69, %c0_70] : memref<9x128x128xbf16, #tpu.memory_space<vmem>>, vector<1x128x128xbf16>
    %70 = vector.shape_cast %69 : vector<1x128x128xbf16> to vector<128x128xbf16>
    %cst_71 = arith.constant dense<0.000000e+00> : vector<64x128xf32>
    %71 = tpu.matmul %68, %70, %cst_71 {dimension_numbers = #tpu.dot_dimension_numbers<[1], [0], [0], [1], [0, 0, 1, 1], [], []>} : vector<64x128xbf16>, vector<128x128xbf16>, vector<64x128xf32> -> vector<64x128xf32>
    %72 = arith.addf %64, %71 : vector<64x128xf32>
    %c0_72 = arith.constant 0 : index
    %c0_73 = arith.constant 0 : index
    %73 = vector.load %arg3[%c0_72, %c0_73] : memref<1x128xf32, #tpu.memory_space<vmem>>, vector<1x128xf32>
    %74 = vector.broadcast %73 : vector<1x128xf32> to vector<64x128xf32>
    %75 = arith.addf %72, %74 : vector<64x128xf32>
    %cst_74 = arith.constant 0.000000e+00 : f32
    %76 = vector.broadcast %cst_74 : f32 to vector<64x128xf32>
    %77 = arith.maximumf %75, %76 : vector<64x128xf32>
    %cst_75 = arith.constant 0.000000e+00 : f32
    %78 = vector.broadcast %cst_75 : f32 to vector<10x10x128xf32>
    %c0_76 = arith.constant 0 : index
    %c0_77 = arith.constant 0 : index
    %c0_78 = arith.constant 0 : index
    %79 = vector.load %arg9[%c0_76, %c0_77, %c0_78] : memref<10x10x128xf32, #tpu.memory_space<vmem>>, vector<10x10x128xf32>
    tpu.vector_store %arg9[%c0_76, %c0_77, %c0_78], %78 {strides = array<i32>} : memref<10x10x128xf32, #tpu.memory_space<vmem>>, vector<10x10x128xf32>,
    %80 = vector.shape_cast %77 : vector<64x128xf32> to vector<8x8x128xf32>
    %c1_79 = arith.constant 1 : index
    %c1_80 = arith.constant 1 : index
    %c0_81 = arith.constant 0 : index
    %81 = vector.load %arg9[%c1_79, %c1_80, %c0_81] : memref<10x10x128xf32, #tpu.memory_space<vmem>>, vector<8x8x128xf32>
    tpu.vector_store %arg9[%c1_79, %c1_80, %c0_81], %80 {strides = array<i32>} : memref<10x10x128xf32, #tpu.memory_space<vmem>>, vector<8x8x128xf32>,
    %cst_82 = arith.constant 0.000000e+00 : f32
    %82 = vector.broadcast %cst_82 : f32 to vector<64x128xf32>
    %c0_83 = arith.constant 0 : index
    %c0_84 = arith.constant 0 : index
    %c0_85 = arith.constant 0 : index
    %83 = vector.load %arg9[%c0_83, %c0_84, %c0_85] : memref<10x10x128xf32, #tpu.memory_space<vmem>>, vector<8x8x128xf32>
    %84 = vector.shape_cast %83 : vector<8x8x128xf32> to vector<64x128xf32>
    %85 = arith.truncf %84 : vector<64x128xf32> to vector<64x128xbf16>
    %c0_86 = arith.constant 0 : index
    %c0_87 = arith.constant 0 : index
    %c0_88 = arith.constant 0 : index
    %86 = vector.load %arg4[%c0_86, %c0_87, %c0_88] : memref<9x128x128xbf16, #tpu.memory_space<vmem>>, vector<1x128x128xbf16>
    %87 = vector.shape_cast %86 : vector<1x128x128xbf16> to vector<128x128xbf16>
    %cst_89 = arith.constant dense<0.000000e+00> : vector<64x128xf32>
    %88 = tpu.matmul %85, %87, %cst_89 {dimension_numbers = #tpu.dot_dimension_numbers<[1], [0], [0], [1], [0, 0, 1, 1], [], []>} : vector<64x128xbf16>, vector<128x128xbf16>, vector<64x128xf32> -> vector<64x128xf32>
    %89 = arith.addf %82, %88 : vector<64x128xf32>
    %c0_90 = arith.constant 0 : index
    %c1_91 = arith.constant 1 : index
    %c0_92 = arith.constant 0 : index
    %90 = vector.load %arg9[%c0_90, %c1_91, %c0_92] : memref<10x10x128xf32, #tpu.memory_space<vmem>>, vector<8x8x128xf32>
    %91 = vector.shape_cast %90 : vector<8x8x128xf32> to vector<64x128xf32>
    %92 = arith.truncf %91 : vector<64x128xf32> to vector<64x128xbf16>
    %c1_93 = arith.constant 1 : index
    %c0_94 = arith.constant 0 : index
    %c0_95 = arith.constant 0 : index
    %93 = vector.load %arg4[%c1_93, %c0_94, %c0_95] : memref<9x128x128xbf16, #tpu.memory_space<vmem>>, vector<1x128x128xbf16>
    %94 = vector.shape_cast %93 : vector<1x128x128xbf16> to vector<128x128xbf16>
    %cst_96 = arith.constant dense<0.000000e+00> : vector<64x128xf32>
    %95 = tpu.matmul %92, %94, %cst_96 {dimension_numbers = #tpu.dot_dimension_numbers<[1], [0], [0], [1], [0, 0, 1, 1], [], []>} : vector<64x128xbf16>, vector<128x128xbf16>, vector<64x128xf32> -> vector<64x128xf32>
    %96 = arith.addf %89, %95 : vector<64x128xf32>
    %c0_97 = arith.constant 0 : index
    %c2_98 = arith.constant 2 : index
    %c0_99 = arith.constant 0 : index
    %97 = vector.load %arg9[%c0_97, %c2_98, %c0_99] : memref<10x10x128xf32, #tpu.memory_space<vmem>>, vector<8x8x128xf32>
    %98 = vector.shape_cast %97 : vector<8x8x128xf32> to vector<64x128xf32>
    %99 = arith.truncf %98 : vector<64x128xf32> to vector<64x128xbf16>
    %c2_100 = arith.constant 2 : index
    %c0_101 = arith.constant 0 : index
    %c0_102 = arith.constant 0 : index
    %100 = vector.load %arg4[%c2_100, %c0_101, %c0_102] : memref<9x128x128xbf16, #tpu.memory_space<vmem>>, vector<1x128x128xbf16>
    %101 = vector.shape_cast %100 : vector<1x128x128xbf16> to vector<128x128xbf16>
    %cst_103 = arith.constant dense<0.000000e+00> : vector<64x128xf32>
    %102 = tpu.matmul %99, %101, %cst_103 {dimension_numbers = #tpu.dot_dimension_numbers<[1], [0], [0], [1], [0, 0, 1, 1], [], []>} : vector<64x128xbf16>, vector<128x128xbf16>, vector<64x128xf32> -> vector<64x128xf32>
    %103 = arith.addf %96, %102 : vector<64x128xf32>
    %c1_104 = arith.constant 1 : index
    %c0_105 = arith.constant 0 : index
    %c0_106 = arith.constant 0 : index
    %104 = vector.load %arg9[%c1_104, %c0_105, %c0_106] : memref<10x10x128xf32, #tpu.memory_space<vmem>>, vector<8x8x128xf32>
    %105 = vector.shape_cast %104 : vector<8x8x128xf32> to vector<64x128xf32>
    %106 = arith.truncf %105 : vector<64x128xf32> to vector<64x128xbf16>
    %c3_107 = arith.constant 3 : index
    %c0_108 = arith.constant 0 : index
    %c0_109 = arith.constant 0 : index
    %107 = vector.load %arg4[%c3_107, %c0_108, %c0_109] : memref<9x128x128xbf16, #tpu.memory_space<vmem>>, vector<1x128x128xbf16>
    %108 = vector.shape_cast %107 : vector<1x128x128xbf16> to vector<128x128xbf16>
    %cst_110 = arith.constant dense<0.000000e+00> : vector<64x128xf32>
    %109 = tpu.matmul %106, %108, %cst_110 {dimension_numbers = #tpu.dot_dimension_numbers<[1], [0], [0], [1], [0, 0, 1, 1], [], []>} : vector<64x128xbf16>, vector<128x128xbf16>, vector<64x128xf32> -> vector<64x128xf32>
    %110 = arith.addf %103, %109 : vector<64x128xf32>
    %c1_111 = arith.constant 1 : index
    %c1_112 = arith.constant 1 : index
    %c0_113 = arith.constant 0 : index
    %111 = vector.load %arg9[%c1_111, %c1_112, %c0_113] : memref<10x10x128xf32, #tpu.memory_space<vmem>>, vector<8x8x128xf32>
    %112 = vector.shape_cast %111 : vector<8x8x128xf32> to vector<64x128xf32>
    %113 = arith.truncf %112 : vector<64x128xf32> to vector<64x128xbf16>
    %c4_114 = arith.constant 4 : index
    %c0_115 = arith.constant 0 : index
    %c0_116 = arith.constant 0 : index
    %114 = vector.load %arg4[%c4_114, %c0_115, %c0_116] : memref<9x128x128xbf16, #tpu.memory_space<vmem>>, vector<1x128x128xbf16>
    %115 = vector.shape_cast %114 : vector<1x128x128xbf16> to vector<128x128xbf16>
    %cst_117 = arith.constant dense<0.000000e+00> : vector<64x128xf32>
    %116 = tpu.matmul %113, %115, %cst_117 {dimension_numbers = #tpu.dot_dimension_numbers<[1], [0], [0], [1], [0, 0, 1, 1], [], []>} : vector<64x128xbf16>, vector<128x128xbf16>, vector<64x128xf32> -> vector<64x128xf32>
    %117 = arith.addf %110, %116 : vector<64x128xf32>
    %c1_118 = arith.constant 1 : index
    %c2_119 = arith.constant 2 : index
    %c0_120 = arith.constant 0 : index
    %118 = vector.load %arg9[%c1_118, %c2_119, %c0_120] : memref<10x10x128xf32, #tpu.memory_space<vmem>>, vector<8x8x128xf32>
    %119 = vector.shape_cast %118 : vector<8x8x128xf32> to vector<64x128xf32>
    %120 = arith.truncf %119 : vector<64x128xf32> to vector<64x128xbf16>
    %c5_121 = arith.constant 5 : index
    %c0_122 = arith.constant 0 : index
    %c0_123 = arith.constant 0 : index
    %121 = vector.load %arg4[%c5_121, %c0_122, %c0_123] : memref<9x128x128xbf16, #tpu.memory_space<vmem>>, vector<1x128x128xbf16>
    %122 = vector.shape_cast %121 : vector<1x128x128xbf16> to vector<128x128xbf16>
    %cst_124 = arith.constant dense<0.000000e+00> : vector<64x128xf32>
    %123 = tpu.matmul %120, %122, %cst_124 {dimension_numbers = #tpu.dot_dimension_numbers<[1], [0], [0], [1], [0, 0, 1, 1], [], []>} : vector<64x128xbf16>, vector<128x128xbf16>, vector<64x128xf32> -> vector<64x128xf32>
    %124 = arith.addf %117, %123 : vector<64x128xf32>
    %c2_125 = arith.constant 2 : index
    %c0_126 = arith.constant 0 : index
    %c0_127 = arith.constant 0 : index
    %125 = vector.load %arg9[%c2_125, %c0_126, %c0_127] : memref<10x10x128xf32, #tpu.memory_space<vmem>>, vector<8x8x128xf32>
    %126 = vector.shape_cast %125 : vector<8x8x128xf32> to vector<64x128xf32>
    %127 = arith.truncf %126 : vector<64x128xf32> to vector<64x128xbf16>
    %c6_128 = arith.constant 6 : index
    %c0_129 = arith.constant 0 : index
    %c0_130 = arith.constant 0 : index
    %128 = vector.load %arg4[%c6_128, %c0_129, %c0_130] : memref<9x128x128xbf16, #tpu.memory_space<vmem>>, vector<1x128x128xbf16>
    %129 = vector.shape_cast %128 : vector<1x128x128xbf16> to vector<128x128xbf16>
    %cst_131 = arith.constant dense<0.000000e+00> : vector<64x128xf32>
    %130 = tpu.matmul %127, %129, %cst_131 {dimension_numbers = #tpu.dot_dimension_numbers<[1], [0], [0], [1], [0, 0, 1, 1], [], []>} : vector<64x128xbf16>, vector<128x128xbf16>, vector<64x128xf32> -> vector<64x128xf32>
    %131 = arith.addf %124, %130 : vector<64x128xf32>
    %c2_132 = arith.constant 2 : index
    %c1_133 = arith.constant 1 : index
    %c0_134 = arith.constant 0 : index
    %132 = vector.load %arg9[%c2_132, %c1_133, %c0_134] : memref<10x10x128xf32, #tpu.memory_space<vmem>>, vector<8x8x128xf32>
    %133 = vector.shape_cast %132 : vector<8x8x128xf32> to vector<64x128xf32>
    %134 = arith.truncf %133 : vector<64x128xf32> to vector<64x128xbf16>
    %c7_135 = arith.constant 7 : index
    %c0_136 = arith.constant 0 : index
    %c0_137 = arith.constant 0 : index
    %135 = vector.load %arg4[%c7_135, %c0_136, %c0_137] : memref<9x128x128xbf16, #tpu.memory_space<vmem>>, vector<1x128x128xbf16>
    %136 = vector.shape_cast %135 : vector<1x128x128xbf16> to vector<128x128xbf16>
    %cst_138 = arith.constant dense<0.000000e+00> : vector<64x128xf32>
    %137 = tpu.matmul %134, %136, %cst_138 {dimension_numbers = #tpu.dot_dimension_numbers<[1], [0], [0], [1], [0, 0, 1, 1], [], []>} : vector<64x128xbf16>, vector<128x128xbf16>, vector<64x128xf32> -> vector<64x128xf32>
    %138 = arith.addf %131, %137 : vector<64x128xf32>
    %c2_139 = arith.constant 2 : index
    %c2_140 = arith.constant 2 : index
    %c0_141 = arith.constant 0 : index
    %139 = vector.load %arg9[%c2_139, %c2_140, %c0_141] : memref<10x10x128xf32, #tpu.memory_space<vmem>>, vector<8x8x128xf32>
    %140 = vector.shape_cast %139 : vector<8x8x128xf32> to vector<64x128xf32>
    %141 = arith.truncf %140 : vector<64x128xf32> to vector<64x128xbf16>
    %c8_142 = arith.constant 8 : index
    %c0_143 = arith.constant 0 : index
    %c0_144 = arith.constant 0 : index
    %142 = vector.load %arg4[%c8_142, %c0_143, %c0_144] : memref<9x128x128xbf16, #tpu.memory_space<vmem>>, vector<1x128x128xbf16>
    %143 = vector.shape_cast %142 : vector<1x128x128xbf16> to vector<128x128xbf16>
    %cst_145 = arith.constant dense<0.000000e+00> : vector<64x128xf32>
    %144 = tpu.matmul %141, %143, %cst_145 {dimension_numbers = #tpu.dot_dimension_numbers<[1], [0], [0], [1], [0, 0, 1, 1], [], []>} : vector<64x128xbf16>, vector<128x128xbf16>, vector<64x128xf32> -> vector<64x128xf32>
    %145 = arith.addf %138, %144 : vector<64x128xf32>
    %c0_146 = arith.constant 0 : index
    %c0_147 = arith.constant 0 : index
    %146 = vector.load %arg5[%c0_146, %c0_147] : memref<1x128xf32, #tpu.memory_space<vmem>>, vector<1x128xf32>
    %147 = vector.broadcast %146 : vector<1x128xf32> to vector<64x128xf32>
    %148 = arith.addf %145, %147 : vector<64x128xf32>
    %c0_148 = arith.constant 0 : index
    %c3_149 = arith.constant 3 : index
    %c0_150 = arith.constant 0 : index
    %c0_151 = arith.constant 0 : index
    %c0_152 = arith.constant 0 : index
    %149 = vector.load %arg1[%c0_148, %c3_149, %c0_150, %c0_151, %c0_152] : memref<1x4x9x9x128xf32, #tpu.memory_space<vmem>>, vector<1x1x8x8x128xf32>
    %150 = vector.shape_cast %149 : vector<1x1x8x8x128xf32> to vector<8x8x128xf32>
    %151 = vector.shape_cast %150 : vector<8x8x128xf32> to vector<64x128xf32>
    %152 = arith.truncf %151 : vector<64x128xf32> to vector<64x128xbf16>
    %c0_153 = arith.constant 0 : index
    %c0_154 = arith.constant 0 : index
    %153 = vector.load %arg6[%c0_153, %c0_154] : memref<128x128xbf16, #tpu.memory_space<vmem>>, vector<128x128xbf16>
    %cst_155 = arith.constant dense<0.000000e+00> : vector<64x128xf32>
    %154 = tpu.matmul %152, %153, %cst_155 {dimension_numbers = #tpu.dot_dimension_numbers<[1], [0], [0], [1], [0, 0, 1, 1], [], []>} : vector<64x128xbf16>, vector<128x128xbf16>, vector<64x128xf32> -> vector<64x128xf32>
    %c0_156 = arith.constant 0 : index
    %c0_157 = arith.constant 0 : index
    %155 = vector.load %arg7[%c0_156, %c0_157] : memref<1x128xf32, #tpu.memory_space<vmem>>, vector<1x128xf32>
    %156 = vector.broadcast %155 : vector<1x128xf32> to vector<64x128xf32>
    %157 = arith.addf %154, %156 : vector<64x128xf32>
    %158 = arith.addf %148, %157 : vector<64x128xf32>
    %cst_158 = arith.constant 0.000000e+00 : f32
    %159 = vector.broadcast %cst_158 : f32 to vector<64x128xf32>
    %160 = arith.maximumf %158, %159 : vector<64x128xf32>
    %161 = vector.shape_cast %160 : vector<64x128xf32> to vector<8x8x128xf32>
    %c0_159 = arith.constant 0 : index
    %c0_160 = arith.constant 0 : index
    %c0_161 = arith.constant 0 : index
    %c0_162 = arith.constant 0 : index
    %162 = vector.load %arg8[%c0_159, %c0_160, %c0_161, %c0_162] : memref<1x8x8x128xf32, #tpu.memory_space<vmem>>, vector<1x8x8x128xf32>
    %163 = vector.shape_cast %162 : vector<1x8x8x128xf32> to vector<8x8x128xf32>
    %164 = vector.shape_cast %161 : vector<8x8x128xf32> to vector<1x8x8x128xf32>
    tpu.vector_store %arg8[%c0_159, %c0_160, %c0_161, %c0_162], %164 {strides = array<i32>} : memref<1x8x8x128xf32, #tpu.memory_space<vmem>>, vector<1x8x8x128xf32>,
    return
  }
  func.func @transform_0(%arg0: i32) -> (i32, i32, i32, i32, i32) {
    %c0_i32 = arith.constant 0 : i32
    %c0_i32_0 = arith.constant 0 : i32
    %c0_i32_1 = arith.constant 0 : i32
    %c0_i32_2 = arith.constant 0 : i32
    %c0_i32_3 = arith.constant 0 : i32
    return %arg0, %c0_i32, %c0_i32_0, %c0_i32_1, %c0_i32_2 : i32, i32, i32, i32, i32
  }
  func.func @transform_1(%arg0: i32) -> (i32, i32, i32) {
    %c0_i32 = arith.constant 0 : i32
    %c0_i32_0 = arith.constant 0 : i32
    %c0_i32_1 = arith.constant 0 : i32
    %c0_i32_2 = arith.constant 0 : i32
    return %c0_i32, %c0_i32_0, %c0_i32_1 : i32, i32, i32
  }
  func.func @transform_2(%arg0: i32) -> (i32, i32) {
    %c0_i32 = arith.constant 0 : i32
    %c0_i32_0 = arith.constant 0 : i32
    %c0_i32_1 = arith.constant 0 : i32
    return %c0_i32, %c0_i32_0 : i32, i32
  }
  func.func @transform_3(%arg0: i32) -> (i32, i32, i32) {
    %c0_i32 = arith.constant 0 : i32
    %c0_i32_0 = arith.constant 0 : i32
    %c0_i32_1 = arith.constant 0 : i32
    %c0_i32_2 = arith.constant 0 : i32
    return %c0_i32, %c0_i32_0, %c0_i32_1 : i32, i32, i32
  }
  func.func @transform_4(%arg0: i32) -> (i32, i32) {
    %c0_i32 = arith.constant 0 : i32
    %c0_i32_0 = arith.constant 0 : i32
    %c0_i32_1 = arith.constant 0 : i32
    return %c0_i32, %c0_i32_0 : i32, i32
  }
  func.func @transform_5(%arg0: i32) -> (i32, i32) {
    %c0_i32 = arith.constant 0 : i32
    %c0_i32_0 = arith.constant 0 : i32
    %c0_i32_1 = arith.constant 0 : i32
    return %c0_i32, %c0_i32_0 : i32, i32
  }
  func.func @transform_6(%arg0: i32) -> (i32, i32) {
    %c0_i32 = arith.constant 0 : i32
    %c0_i32_0 = arith.constant 0 : i32
    %c0_i32_1 = arith.constant 0 : i32
    return %c0_i32, %c0_i32_0 : i32, i32
  }
  func.func @transform_7(%arg0: i32) -> (i32, i32, i32, i32) {
    %c0_i32 = arith.constant 0 : i32
    %c0_i32_0 = arith.constant 0 : i32
    %c0_i32_1 = arith.constant 0 : i32
    %c0_i32_2 = arith.constant 0 : i32
    return %arg0, %c0_i32, %c0_i32_0, %c0_i32_1 : i32, i32, i32, i32
  }
}

</mosaic_0001>

<bundles_post_ra>
// kernel: _forward.1
= control target key start
LH: loop header
LB: loop body
LE: loop exit
PB: predicated region body
PF: predicated region fallthrough
CT: control target
= control target key end

     0   :  { %s4643_s24 = smov 0   ;;  %s5612_s0 = inlined_call_operand.vmem [shape: f32[2,4,9,9,128], index: 0, kind: input, shape index: {}]   ;;  %s5613_s1 = inlined_call_operand.vmem [shape: bf16[9,128,128], index: 1, kind: input, shape index: {}]   ;;  %s5614_s2 = inlined_call_operand.vmem [shape: f32[1,128], index: 2, kind: input, shape index: {}]   ;;  %s5615_s3 = inlined_call_operand.vmem [shape: bf16[9,128,128], index: 3, kind: input, shape index: {}]   ;;  %s5616_s4 = inlined_call_operand.vmem [shape: f32[1,128], index: 4, kind: input, shape index: {}]   ;;  %s5617_s5 = inlined_call_operand.vmem [shape: bf16[128,128], index: 5, kind: input, shape index: {}]   ;;  %s5618_s6 = inlined_call_operand.vmem [shape: f32[1,128], index: 6, kind: input, shape index: {}]   ;;  %s5619_s7 = inlined_call_operand.vmem [shape: f32[2,8,8,128], index: 7, kind: output, shape index: {}]  }
   0x1 LB: > { %s3246_s25 = sadd.s32 4294967295, %s4600_s24   ;;  %p3250_p0 = scmp.ge.s32.totalorder %s4600_s24, 1  ;;  %s4600_s24 = sphi %s4643_s24, %s17_s24  }
   0x2   : > { %p237_p1 = scmp.lt.s32.totalorder %s4600_s24, 3 }
   0x4   : > { %p238_p2 = pnand %p3250_p0, %p237_p1 }
   0x6   : > { %241 = sbr.rel (%p238_p2) target bundleno = 747 (0x2eb), region = 48 }
   0xb   : > { %v4442_v0 = vld [vmem:[%s5613_s1 + $0x78] sm:$0xff]   ;;  %p269_p3 = scmp.lt.s32.totalorder %s3246_s25, 1  ;;  %v4444_v2 = vld [vmem:[%s5613_s1 + $0x70] sm:$0xff]   ;;  %v4446_v4 = vld [vmem:[%s5613_s1 + $0x68] sm:$0xff]  }
   0xc   : > { %v4443_v1 = vld [vmem:[%s5613_s1 + $0x38] sm:$0xff]   ;;  %3960 = vmatprep.subr.bf16.mxu0 %v4442_v0  ;;  %v4445_v3 = vld [vmem:[%s5613_s1 + $0x30] sm:$0xff]   ;;  %v4447_v5 = vld [vmem:[%s5613_s1 + $0x28] sm:$0xff]  }
   0xd   : > { %3984 = vmatprep.subr.bf16.mxu1 %v4443_v1  ;;  %3961 = vmatpush3.bf16.msra.mxu0 %v4442_v0  ;;  %s5650_s25 = smov (!%p269_p3, %s3246_s25), 1  ;;  %v4448_v6 = vld [vmem:[%s5613_s1 + $0x60] sm:$0xff]   ;;  %v4450_v8 = vld [vmem:[%s5613_s1 + $0x58] sm:$0xff]   ;;  %v4452_v10 = vld [vmem:[%s5613_s1 + $0x50] sm:$0xff]  }
   0xe   : > { %3985 = vmatpush3.bf16.msra.mxu1 %v4443_v1  ;;  %3962 = vmatprep.subr.bf16.mxu0 %v4444_v2  ;;  %v4449_v7 = vld [vmem:[%s5613_s1 + $0x20] sm:$0xff]   ;;  %s4432_s19 = smul.u32 576, %s5650_s25  ;;  %v4451_v9 = vld [vmem:[%s5613_s1 + $0x18] sm:$0xff]   ;;  %v4453_v14 = vld [vmem:[%s5613_s1 + $0x10] sm:$0xff]   ;;  %s3731_s15 = sshll.u32 %s5650_s25, 6 }
   0xf   : > { %3986 = vmatprep.subr.bf16.mxu1 %v4445_v3  ;;  %v4454_v22 = vld [vmem:[%s5613_s1 + $0x48] sm:$0xff]   ;;  %v4456_v24 = vld [vmem:[%s5613_s1 + $0x40] sm:$0xff]   ;;  %v4458_v29 = vld [vmem:[%s5613_s1 + $0xb8] sm:$0xff]   ;;  %s5559_s18 = scalar_lea.vmem %s5619_s7, %s3731_s15 }
  0x10   : > { %s4687_s28 = scalar_lea.vmem %s5612_s0, %s4432_s19  ;;  %v4455_v23 = vld [vmem:[%s5613_s1 + $0x8] sm:$0xff]   ;;  %v4457_v25 = vld [vmem:[%s5613_s1] sm:$0xff]   ;;  %v4459_v30 = vld [vmem:[%s5613_s1 + $0xf8] sm:$0xff]  }
  0x11   : > { %3963 = vmatpush3.bf16.msra.mxu0 %v4444_v2  ;;  %v3254_v11 = vld [vmem:[%s4687_s28 + $0x90] sm:$0xff]  ;;  %v4694_v12 = vld [vmem:[%s4687_s28 + $0xa0] sm:$0xff]  ;;  %v4462_v45 = vld [vmem:[%s5613_s1 + $0xa8] sm:$0xff]  }
  0x12   : > { %3987 = vmatpush3.bf16.msra.mxu1 %v4445_v3  ;;  %3964 = vmatprep.subr.bf16.mxu0 %v4446_v4  ;;  %v280_v13 = vld [vmem:[%s4687_s28] sm:$0xff]  ;;  %v317_v15 = vpack.c.bf16 %v4694_v12, %v3254_v11  ;;  %v4702_v16 = vld [vmem:[%s4687_s28 + $0x10] sm:$0xff]  ;;  %v4463_v49 = vld [vmem:[%s5613_s1 + $0xe8] sm:$0xff]  }
  0x13   : > { %3988 = vmatprep.subr.bf16.mxu1 %v4447_v5  ;;  %v4705_v17 = vld [vmem:[%s4687_s28 + $0xb0] sm:$0xff]  ;;  %v288_v18 = vpack.c.bf16 %v4702_v16, %v280_v13  ;;  %v4709_v19 = vld [vmem:[%s4687_s28 + $0x20] sm:$0xff]  ;;  %v4466_v61 = vld [vmem:[%s5613_s1 + $0x98] sm:$0xff]  }
  0x14   : > { %v1326_v20 = vpack.c.bf16 %v4705_v17, %v4694_v12  ;;  %3976 = vmatprep.mubr.bf16.mxu0 %v317_v15  ;;  %v1175_v21 = vpack.c.bf16 %v4709_v19, %v4702_v16  ;;  %v4728_v26 = vld [vmem:[%s4687_s28 + $0xc0] sm:$0xff]  ;;  %v4731_v27 = vld [vmem:[%s4687_s28 + $0x30] sm:$0xff]  ;;  %v4467_v3 = vld [vmem:[%s5613_s1 + $0xd8] sm:$0xff]  }
  0x15   : > { %3965 = vmatpush3.bf16.msra.mxu0 %v4446_v4  ;;  %4000 = vmatprep.mubr.bf16.mxu1 %v288_v18  ;;  %v4734_v28 = vld [vmem:[%s4687_s28 + $0xd0] sm:$0xff]  ;;  %v4743_v31 = vld [vmem:[%s4687_s28 + $0x40] sm:$0xff]  ;;  %v318_v35 = vpack.c.bf16 %v4728_v26, %v4705_v17  ;;  %v289_v39 = vpack.c.bf16 %v4731_v27, %v4709_v19  ;;  %v4474_v13 = vld [vmem:[%s5613_s1 + $0x138] sm:$0xff]  }
  0x16   : > { %3989 = vmatpush3.bf16.msra.mxu1 %v4447_v5  ;;  %3966 = vmatprep.subr.bf16.mxu0 %v4448_v6  ;;  %v1327_v32 = vpack.c.bf16 %v4734_v28, %v4728_v26  ;;  %v4748_v33 = vld [vmem:[%s4687_s28 + $0xe0] sm:$0xff]  ;;  %v1176_v34 = vpack.c.bf16 %v4743_v31, %v4731_v27  ;;  %v4755_v36 = vld [vmem:[%s4687_s28 + $0x50] sm:$0xff]  ;;  %v4475_v18 = vld [vmem:[%s5613_s1 + $0x178] sm:$0xff]  }
  0x17   : > { %3990 = vmatprep.subr.bf16.mxu1 %v4449_v7  ;;  %v4758_v37 = vld [vmem:[%s4687_s28 + $0xf0] sm:$0xff]  ;;  %v4761_v38 = vld [vmem:[%s4687_s28 + $0x60] sm:$0xff]  ;;  %v319_v44 = vpack.c.bf16 %v4748_v33, %v4734_v28  ;;  %v290_v46 = vpack.c.bf16 %v4755_v36, %v4743_v31  ;;  %v4502_v16 = vld [vmem:[%s5613_s1 + $0x188] sm:$0xff]  }
  0x18   : > { %v1177_v40 = vpack.c.bf16 %v4761_v38, %v4755_v36  ;;  %v1328_v41 = vpack.c.bf16 %v4758_v37, %v4748_v33  ;;  %v4460_v42 = vld [vmem:[%s5613_s1 + $0xb0] sm:$0xff]   ;;  %v4783_v47 = vld [vmem:[%s4687_s28 + $0x100] sm:$0xff]  ;;  %v4503_v19 = vld [vmem:[%s5613_s1 + $0x1c8] sm:$0xff]  }
  0x19   : > { %3967 = vmatpush3.bf16.msra.mxu0 %v4448_v6  ;;  %v4461_v43 = vld [vmem:[%s5613_s1 + $0xf0] sm:$0xff]   ;;  %v564_v50 = vld [vmem:[%s4687_s28 + $0x1] sm:$0xff]  ;;  %v320_v51 = vpack.c.bf16 %v4783_v47, %v4758_v37  ;;  %v4510_v26 = vld [vmem:[%s5613_s1 + $0x218] sm:$0xff]  }
  0x1a   : > { %3991 = vmatpush3.bf16.msra.mxu1 %v4449_v7  ;;  %3968 = vmatprep.subr.bf16.mxu0 %v4450_v8  ;;  %v4786_v48 = vld [vmem:[%s4687_s28 + $0x70] sm:$0xff]  ;;  %v4798_v53 = vld [vmem:[%s4687_s28 + $0x21] sm:$0xff] }
  0x1b   : > { %3992 = vmatprep.subr.bf16.mxu1 %v4451_v9  ;;  %v4795_v52 = vld [vmem:[%s4687_s28 + $0x11] sm:$0xff]  ;;  %v291_v54 = vpack.c.bf16 %v4786_v48, %v4761_v38  ;;  %v3318_v55 = vld [vmem:[%s4687_s28 + $0x120] sm:$0xff] }
  0x1c   : > { %v1476_v56 = vpack.c.bf16 %v4798_v53, %v4795_v52  ;;  %v4464_v57 = vld [vmem:[%s5613_s1 + $0xa0] sm:$0xff]   ;;  %v3319_v58 = vld [vmem:[%s4687_s28 + $0x130] sm:$0xff]  ;;  %v572_v60 = vpack.c.bf16 %v4795_v52, %v564_v50  ;;  %v4514_v38 = vld [vmem:[%s5615_s3 + $0x78] sm:$0xff]  }
  0x1d   : > { %3969 = vmatpush3.bf16.msra.mxu0 %v4450_v8  ;;  %v4465_v59 = vld [vmem:[%s5613_s1 + $0xe0] sm:$0xff]   ;;  %v723_v62 = vpack.c.bf16 %v3319_v58, %v3318_v55  ;;  %v4817_v63 = vld [vmem:[%s4687_s28 + $0x31] sm:$0xff]  ;;  %v4470_v8 = vld [vmem:[%s5613_s1 + $0x88] sm:$0xff]  }
  0x1e   : > { %3993 = vmatpush3.bf16.msra.mxu1 %v4451_v9  ;;  %3970 = vmatprep.subr.bf16.mxu0 %v4452_v10  ;;  %v4820_v0 = vld [vmem:[%s4687_s28 + $0x41] sm:$0xff]  ;;  %v4823_v1 = vld [vmem:[%s4687_s28 + $0x51] sm:$0xff] }
  0x1f   : > { %3994 = vmatprep.subr.bf16.mxu1 %v4453_v14  ;;  %v4826_v2 = vld [vmem:[%s4687_s28 + $0x61] sm:$0xff]  ;;  %v1477_v4 = vpack.c.bf16 %v4820_v0, %v4817_v63  ;;  %v4468_v6 = vld [vmem:[%s5613_s1 + $0x90] sm:$0xff]  }
  0x20   : > { %v1478_v5 = vpack.c.bf16 %v4826_v2, %v4823_v1  ;;  %v4469_v7 = vld [vmem:[%s5613_s1 + $0xd0] sm:$0xff]   ;;  %v4471_v9 = vld [vmem:[%s5613_s1 + $0xc8] sm:$0xff]   ;;  %v4473_v11 = vld [vmem:[%s5613_s1 + $0xc0] sm:$0xff]  }
  0x21   : > { %3971 = vmatpush3.bf16.msra.mxu0 %v4452_v10  ;;  %v4472_v10 = vld [vmem:[%s5613_s1 + $0x80] sm:$0xff]   ;;  %v3321_v15 = vld [vmem:[%s4687_s28 + $0x150] sm:$0xff]  ;;  %v4519_v52 = vld [vmem:[%s5615_s3 + $0x28] sm:$0xff]  }
  0x22   : > { %3995 = vmatpush3.bf16.msra.mxu1 %v4453_v14  ;;  %3972 = vmatprep.subr.bf16.mxu0 %v4454_v22  ;;  %v3320_v14 = vld [vmem:[%s4687_s28 + $0x140] sm:$0xff]  ;;  %v4511_v28 = vld [vmem:[%s5613_s1 + $0x210] sm:$0xff]  }
  0x23   : > { %3996 = vmatprep.subr.bf16.mxu1 %v4455_v23  ;;  %v3351_v50 = vld [vmem:[%s4687_s28 + $0x1c0] sm:$0xff] }
  0x24   : > { %v4480_v58 = vld [vmem:[%s5613_s1 + $0x120] sm:$0xff]  }
  0x25   : > { %3973 = vmatpush3.bf16.msra.mxu0 %v4454_v22  ;;  %v573_v22 = vpack.c.bf16 %v4817_v63, %v4798_v53  ;;  %v4504_v12 = vld [vmem:[%s5613_s1 + $0x180] sm:$0xff]  }
  0x26   : > { %3997 = vmatpush3.bf16.msra.mxu1 %v4455_v23  ;;  %3974 = vmatprep.subr.bf16.mxu0 %v4456_v24  ;;  %v3322_v23 = vld [vmem:[%s4687_s28 + $0x160] sm:$0xff] }
  0x27   : > { %3998 = vmatprep.subr.bf16.mxu1 %v4457_v25  ;;  %v4505_v17 = vld [vmem:[%s5613_s1 + $0x1c0] sm:$0xff]  }
  0x28   : > { %v4509_v31 = vld [vmem:[%s5613_s1 + $0x220] sm:$0xff]  }
  0x29   : > { %3975 = vmatpush3.bf16.msra.mxu0 %v4456_v24  ;;  %v724_v24 = vpack.c.bf16 %v3321_v15, %v3320_v14  ;;  %v3353_v14 = vld [vmem:[%s4687_s28 + $0x1e0] sm:$0xff]  ;;  %v4490_v15 = vld [vmem:[%s5613_s1 + $0x1b8] sm:$0xff]  }
  0x2a   : > { %3999 = vmatpush3.bf16.msra.mxu1 %v4457_v25  ;;  %4008 = vmatprep.subr.bf16.mxu0 %v4458_v29  ;;  %v3323_v25 = vld [vmem:[%s4687_s28 + $0x170] sm:$0xff]  ;;  %v4513_v33 = vld [vmem:[%s5613_s1 + $0x200] sm:$0xff]  }
  0x2b   : > { %4032 = vmatprep.subr.bf16.mxu1 %v4459_v30  ;;  %v3485_v36 = vld [vmem:[%s4687_s28 + $0x81] sm:$0xff] }
  0x2c   : > { %3977 = vmatmul.mubr.bf16.vlgmr.msra.gmra.mxu0 %v318_v35  ;;  %v574_v35 = vpack.c.bf16 %v4823_v1, %v4820_v0  ;;  %v4520_v53 = vld [vmem:[%s5615_s3 + $0x60] sm:$0xff]   ;;  %v4524_v0 = vld [vmem:[%s5615_s3 + $0x50] sm:$0xff]   ;;  %v5620_v1 = vmov 0.0  }
  0x2d   : > { %4001 = vmatmul.mubr.bf16.vlgmr.msra.gmra.mxu1 %v289_v39  ;;  %4009 = vmatpush3.bf16.msra.mxu0 %v4458_v29  ;;  %v4476_v29 = vld [vmem:[%s5613_s1 + $0x130] sm:$0xff]   ;;  %v4521_v63 = vld [vmem:[%s5615_s3 + $0x20] sm:$0xff]   ;;  %1647 = vst [vmem:[#allocation2 + $0x30] sm:$0xff] %v5620_v1  ;;  %1648 = vst [vmem:[#allocation2 + $0x38] sm:$0x3] %v5620_v1 }
  0x2e   : > { %4033 = vmatpush3.bf16.msra.mxu1 %v4459_v30  ;;  %4010 = vmatprep.subr.bf16.mxu0 %v4460_v42  ;;  %v4477_v30 = vld [vmem:[%s5613_s1 + $0x170] sm:$0xff]   ;;  %1641 = vst [vmem:[#allocation2] sm:$0xff] %v5620_v1  ;;  %1642 = vst [vmem:[#allocation2 + $0x8] sm:$0x3] %v5620_v1 }
  0x2f   : > { %4034 = vmatprep.subr.bf16.mxu1 %v4461_v43  ;;  %3980 = vmatprep.mubr.bf16.mxu0 %v319_v44  ;;  %v4874_v39 = vld [vmem:[%s4687_s28 + $0x71] sm:$0xff]  ;;  %v3324_v44 = vld [vmem:[%s4687_s28 + $0x180] sm:$0xff]  ;;  %1643 = vst [vmem:[#allocation2 + $0x10] sm:$0xff] %v5620_v1  ;;  %1644 = vst [vmem:[#allocation2 + $0x18] sm:$0x3] %v5620_v1 }
  0x30   : > { %4004 = vmatprep.mubr.bf16.mxu1 %v290_v46  ;;  %v4479_v46 = vld [vmem:[%s5613_s1 + $0x168] sm:$0xff]   ;;  %v1479_v37 = vpack.c.bf16 %v3485_v36, %v4874_v39  ;;  %1645 = vst [vmem:[#allocation2 + $0x20] sm:$0xff] %v5620_v1  ;;  %1646 = vst [vmem:[#allocation2 + $0x28] sm:$0x3] %v5620_v1 }
  0x31   : > { %4011 = vmatpush3.bf16.msra.mxu0 %v4460_v42  ;;  %v725_v42 = vpack.c.bf16 %v3323_v25, %v3322_v23  ;;  %v4491_v23 = vld [vmem:[%s5613_s1 + $0x1f8] sm:$0xff]   ;;  %v3355_v25 = vld [vmem:[%s4687_s28 + $0x200] sm:$0xff]  ;;  %1649 = vst [vmem:[#allocation2 + $0x40] sm:$0xff] %v5620_v1  ;;  %1650 = vst [vmem:[#allocation2 + $0x48] sm:$0x3] %v5620_v1 }
  0x32   : > { %4035 = vmatpush3.bf16.msra.mxu1 %v4461_v43  ;;  %4012 = vmatprep.subr.bf16.mxu0 %v4462_v45  ;;  %v4478_v43 = vld [vmem:[%s5613_s1 + $0x128] sm:$0xff]   ;;  %1651 = vst [vmem:[#allocation2 + $0x50] sm:$0xff] %v5620_v1  ;;  %1652 = vst [vmem:[#allocation2 + $0x58] sm:$0x3] %v5620_v1 }
  0x33   : > { %4036 = vmatprep.subr.bf16.mxu1 %v4463_v49  ;;  %1653 = vst [vmem:[#allocation2 + $0x60] sm:$0xff] %v5620_v1  ;;  %1654 = vst [vmem:[#allocation2 + $0x68] sm:$0x3] %v5620_v1 }
  0x34   : > { %3981 = vmatmul.mubr.bf16.gmra.mxu0 %v320_v51  ;;  %v575_v51 = vpack.c.bf16 %v4874_v39, %v4826_v2  ;;  %1655 = vst [vmem:[#allocation2 + $0x70] sm:$0xff] %v5620_v1  ;;  %1656 = vst [vmem:[#allocation2 + $0x78] sm:$0x3] %v5620_v1  ;;  %v4523_v2 = vld [vmem:[%s5615_s3 + $0x18] sm:$0xff]   ;;  %v4528_v39 = vld [vmem:[%s5615_s3 + $0x40] sm:$0xff]  }
  0x35   : > { %4013 = vmatpush3.bf16.msra.mxu0 %v4462_v45  ;;  %4005 = vmatmul.mubr.bf16.gmra.mxu1 %v291_v54  ;;  %v3325_v45 = vld [vmem:[%s4687_s28 + $0x190] sm:$0xff]  ;;  %v3382_v54 = vld [vmem:[%s4687_s28 + $0x121] sm:$0xff]  ;;  %1657 = vst [vmem:[#allocation2 + $0x80] sm:$0xff] %v5620_v1  ;;  %1658 = vst [vmem:[#allocation2 + $0x88] sm:$0x3] %v5620_v1 }
  0x36   : > { %4037 = vmatpush3.bf16.msra.mxu1 %v4463_v49  ;;  %4014 = vmatprep.subr.bf16.mxu0 %v4464_v57  ;;  %v3350_v49 = vld [vmem:[%s4687_s28 + $0x1b0] sm:$0xff]  ;;  %v726_v55 = vpack.c.bf16 %v3325_v45, %v3324_v44  ;;  %1659 = vst [vmem:[#allocation2 + $0x90] sm:$0xff] %v5620_v1  ;;  %1660 = vst [vmem:[#allocation2 + $0x98] sm:$0x3] %v5620_v1 }
  0x37   : > { %4038 = vmatprep.subr.bf16.mxu1 %v4465_v59  ;;  %4024 = vmatprep.mubr.bf16.mxu0 %v572_v60  ;;  %v874_v60 = vpack.c.bf16 %v3351_v50, %v3350_v49  ;;  %v4493_v44 = vld [vmem:[%s5613_s1 + $0x1f0] sm:$0xff]   ;;  %v3357_v49 = vld [vmem:[%s4687_s28 + $0x220] sm:$0xff]  ;;  %v4494_v50 = vld [vmem:[%s5613_s1 + $0x1a8] sm:$0xff]  }
  0x38   : > { %4048 = vmatprep.mubr.bf16.mxu1 %v723_v62  ;;  %v4482_v62 = vld [vmem:[%s5613_s1 + $0x118] sm:$0xff]  }
  0x39   : > { %4015 = vmatpush3.bf16.msra.mxu0 %v4464_v57  ;;  %v3383_v57 = vld [vmem:[%s4687_s28 + $0x131] sm:$0xff] }
  0x3a   : > { %4039 = vmatpush3.bf16.msra.mxu1 %v4465_v59  ;;  %4016 = vmatprep.subr.bf16.mxu0 %v4466_v61  ;;  %v4481_v59 = vld [vmem:[%s5613_s1 + $0x160] sm:$0xff]  }
  0x3b   : > { %4040 = vmatprep.subr.bf16.mxu1 %v4467_v3 }
  0x3d   : > { %4017 = vmatpush3.bf16.msra.mxu0 %v4466_v61  ;;  %v1024_v61 = vpack.c.bf16 %v3383_v57, %v3382_v54  ;;  %v3388_v54 = vld [vmem:[%s4687_s28 + $0x181] sm:$0xff] }
  0x3e   : > { %4041 = vmatpush3.bf16.msra.mxu1 %v4467_v3  ;;  %4018 = vmatprep.subr.bf16.mxu0 %v4468_v6  ;;  %v4483_v3 = vld [vmem:[%s5613_s1 + $0x158] sm:$0xff]   ;;  %v4495_v57 = vld [vmem:[%s5613_s1 + $0x1e8] sm:$0xff]  }
  0x3f   : > { %4042 = vmatprep.subr.bf16.mxu1 %v4469_v7 }
  0x41   : > { %4019 = vmatpush3.bf16.msra.mxu0 %v4468_v6  ;;  %v4484_v6 = vld [vmem:[%s5613_s1 + $0x110] sm:$0xff]  }
  0x42   : > { %4043 = vmatpush3.bf16.msra.mxu1 %v4469_v7  ;;  %4020 = vmatprep.subr.bf16.mxu0 %v4470_v8  ;;  %v4485_v7 = vld [vmem:[%s5613_s1 + $0x150] sm:$0xff]  }
  0x43   : > { %4044 = vmatprep.subr.bf16.mxu1 %v4471_v9 }
  0x45   : > { %4021 = vmatpush3.bf16.msra.mxu0 %v4470_v8  ;;  %v4486_v8 = vld [vmem:[%s5613_s1 + $0x108] sm:$0xff]  }
  0x46   : > { %4045 = vmatpush3.bf16.msra.mxu1 %v4471_v9  ;;  %4022 = vmatprep.subr.bf16.mxu0 %v4472_v10  ;;  %v4487_v9 = vld [vmem:[%s5613_s1 + $0x148] sm:$0xff]  }
  0x47   : > { %4046 = vmatprep.subr.bf16.mxu1 %v4473_v11 }
  0x49   : > { %4023 = vmatpush3.bf16.msra.mxu0 %v4472_v10  ;;  %v4488_v10 = vld [vmem:[%s5613_s1 + $0x100] sm:$0xff]  }
  0x4a   : > { %4047 = vmatpush3.bf16.msra.mxu1 %v4473_v11  ;;  %4056 = vmatprep.subr.bf16.mxu0 %v4474_v13  ;;  %v4489_v11 = vld [vmem:[%s5613_s1 + $0x140] sm:$0xff]  }
  0x4b   : > { %4080 = vmatprep.subr.bf16.mxu1 %v4475_v18 }
  0x4c   : > { %4025 = vmatmul.mubr.bf16.vlgmr.msra.gmra.mxu0 %v573_v22  ;;  %v3385_v22 = vld [vmem:[%s4687_s28 + $0x151] sm:$0xff] }
  0x4d   : > { %4057 = vmatpush3.bf16.msra.mxu0 %v4474_v13  ;;  %4049 = vmatmul.mubr.bf16.vlgmr.msra.gmra.mxu1 %v724_v24  ;;  %v3352_v13 = vld [vmem:[%s4687_s28 + $0x1d0] sm:$0xff] }
  0x4e   : > { %4081 = vmatpush3.bf16.msra.mxu1 %v4475_v18  ;;  %4058 = vmatprep.subr.bf16.mxu0 %v4476_v29  ;;  %v3384_v18 = vld [vmem:[%s4687_s28 + $0x141] sm:$0xff]  ;;  %v3354_v24 = vld [vmem:[%s4687_s28 + $0x1f0] sm:$0xff] }
  0x4f   : > { %4082 = vmatprep.subr.bf16.mxu1 %v4477_v30  ;;  %4028 = vmatprep.mubr.bf16.mxu0 %v574_v35  ;;  %v875_v35 = vpack.c.bf16 %v3353_v14, %v3352_v13  ;;  %v876_v45 = vpack.c.bf16 %v3355_v25, %v3354_v24  ;;  %v4527_v13 = vld [vmem:[%s5615_s3 + $0x8] sm:$0xff]   ;;  %v5107_v14 = vld [vmem:[%s5615_s3 + $0xb8] sm:$0xff]  }
  0x50   : > { %4052 = vmatprep.mubr.bf16.mxu1 %v725_v42  ;;  %v4492_v42 = vld [vmem:[%s5613_s1 + $0x1b0] sm:$0xff]   ;;  %5624 = vst [vmem:[#allocation3_spill] sm:$0xff] %v5107_v14  ;;  %v5116_v24 = vld [vmem:[%s5615_s3 + $0xf8] sm:$0xff]  }
  0x51   : > { %4059 = vmatpush3.bf16.msra.mxu0 %v4476_v29  ;;  %v3386_v29 = vld [vmem:[%s4687_s28 + $0x161] sm:$0xff]  ;;  %5625 = vst [vmem:[#allocation4_spill] sm:$0xff] %v5116_v24 }
  0x52   : > { %4083 = vmatpush3.bf16.msra.mxu1 %v4477_v30  ;;  %4060 = vmatprep.subr.bf16.mxu0 %v4478_v43  ;;  %v3387_v30 = vld [vmem:[%s4687_s28 + $0x171] sm:$0xff] }
  0x53   : > { %4084 = vmatprep.subr.bf16.mxu1 %v4479_v46 }
  0x54   : > { %4029 = vmatmul.mubr.bf16.gmra.mxu0 %v575_v51  ;;  %v1026_v51 = vpack.c.bf16 %v3387_v30, %v3386_v29 }
  0x55   : > { %4061 = vmatpush3.bf16.msra.mxu0 %v4478_v43  ;;  %4053 = vmatmul.mubr.bf16.gmra.mxu1 %v726_v55  ;;  %v1025_v43 = vpack.c.bf16 %v3385_v22, %v3384_v18  ;;  %v3389_v55 = vld [vmem:[%s4687_s28 + $0x191] sm:$0xff]  ;;  %v4529_v18 = vld [vmem:[%s5615_s3] sm:$0xff]  }
  0x56   : > { %4085 = vmatpush3.bf16.msra.mxu1 %v4479_v46  ;;  %4062 = vmatprep.subr.bf16.mxu0 %v4480_v58  ;;  %v3356_v46 = vld [vmem:[%s4687_s28 + $0x210] sm:$0xff] }
  0x57   : > { %4086 = vmatprep.subr.bf16.mxu1 %v4481_v59  ;;  %4072 = vmatprep.mubr.bf16.mxu0 %v874_v60  ;;  %v1027_v60 = vpack.c.bf16 %v3389_v55, %v3388_v54 }
  0x58   : > { %4096 = vmatprep.mubr.bf16.mxu1 %v1024_v61  ;;  %v4497_v61 = vld [vmem:[%s5613_s1 + $0x1e0] sm:$0xff]  }
  0x59   : > { %4063 = vmatpush3.bf16.msra.mxu0 %v4480_v58  ;;  %v877_v58 = vpack.c.bf16 %v3357_v49, %v3356_v46 }
  0x5a   : > { %4087 = vmatpush3.bf16.msra.mxu1 %v4481_v59  ;;  %4064 = vmatprep.subr.bf16.mxu0 %v4482_v62  ;;  %v4496_v59 = vld [vmem:[%s5613_s1 + $0x1a0] sm:$0xff]  }
  0x5b   : > { %4088 = vmatprep.subr.bf16.mxu1 %v4483_v3 }
  0x5d   : > { %4065 = vmatpush3.bf16.msra.mxu0 %v4482_v62  ;;  %v4498_v62 = vld [vmem:[%s5613_s1 + $0x198] sm:$0xff]  }
  0x5e   : > { %4089 = vmatpush3.bf16.msra.mxu1 %v4483_v3  ;;  %4066 = vmatprep.subr.bf16.mxu0 %v4484_v6  ;;  %v4499_v3 = vld [vmem:[%s5613_s1 + $0x1d8] sm:$0xff]  }
  0x5f   : > { %4090 = vmatprep.subr.bf16.mxu1 %v4485_v7 }
  0x61   : > { %4067 = vmatpush3.bf16.msra.mxu0 %v4484_v6  ;;  %v4500_v6 = vld [vmem:[%s5613_s1 + $0x190] sm:$0xff]  }
  0x62   : > { %4091 = vmatpush3.bf16.msra.mxu1 %v4485_v7  ;;  %4068 = vmatprep.subr.bf16.mxu0 %v4486_v8  ;;  %v4501_v7 = vld [vmem:[%s5613_s1 + $0x1d0] sm:$0xff]  }
  0x63   : > { %4092 = vmatprep.subr.bf16.mxu1 %v4487_v9 }
  0x65   : > { %4069 = vmatpush3.bf16.msra.mxu0 %v4486_v8  ;;  %v3421_v8 = vld [vmem:[%s4687_s28 + $0x80] sm:$0xff] }
  0x66   : > { %4093 = vmatpush3.bf16.msra.mxu1 %v4487_v9  ;;  %4070 = vmatprep.subr.bf16.mxu0 %v4488_v10  ;;  %v4508_v9 = vld [vmem:[%s5613_s1 + $0x228] sm:$0xff]   ;;  %v1178_v27 = vpack.c.bf16 %v3421_v8, %v4786_v48 }
  0x67   : > { %4094 = vmatprep.subr.bf16.mxu1 %v4489_v11  ;;  %v4518_v48 = vld [vmem:[%s5615_s3 + $0x68] sm:$0xff]  }
  0x69   : > { %4071 = vmatpush3.bf16.msra.mxu0 %v4488_v10  ;;  %v3453_v10 = vld [vmem:[%s4687_s28 + $0x110] sm:$0xff] }
  0x6a   : > { %4095 = vmatpush3.bf16.msra.mxu1 %v4489_v11  ;;  %4104 = vmatprep.subr.bf16.mxu0 %v4490_v15 }
  0x6b   : > { %4128 = vmatprep.subr.bf16.mxu1 %v4491_v23 }
  0x6c   : > { %4073 = vmatmul.mubr.bf16.vlgmr.msra.gmra.mxu0 %v875_v35 }
  0x6d   : > { %4105 = vmatpush3.bf16.msra.mxu0 %v4490_v15  ;;  %4097 = vmatmul.mubr.bf16.vlgmr.msra.gmra.mxu1 %v1025_v43 }
  0x6e   : > { %4129 = vmatpush3.bf16.msra.mxu1 %v4491_v23  ;;  %4106 = vmatprep.subr.bf16.mxu0 %v4492_v42 }
  0x6f   : > { %4130 = vmatprep.subr.bf16.mxu1 %v4493_v44  ;;  %4076 = vmatprep.mubr.bf16.mxu0 %v876_v45 }
  0x70   : > { %4100 = vmatprep.mubr.bf16.mxu1 %v1026_v51 }
  0x71   : > { %4107 = vmatpush3.bf16.msra.mxu0 %v4492_v42 }
  0x72   : > { %4131 = vmatpush3.bf16.msra.mxu1 %v4493_v44  ;;  %4108 = vmatprep.subr.bf16.mxu0 %v4494_v50 }
  0x73   : > { %4132 = vmatprep.subr.bf16.mxu1 %v4495_v57 }
  0x74   : > { %4077 = vmatmul.mubr.bf16.gmra.mxu0 %v877_v58 }
  0x75   : > { %4109 = vmatpush3.bf16.msra.mxu0 %v4494_v50  ;;  %4101 = vmatmul.mubr.bf16.gmra.mxu1 %v1027_v60 }
  0x76   : > { %4133 = vmatpush3.bf16.msra.mxu1 %v4495_v57  ;;  %4110 = vmatprep.subr.bf16.mxu0 %v4496_v59 }
  0x77   : > { %4134 = vmatprep.subr.bf16.mxu1 %v4497_v61  ;;  %4120 = vmatprep.mubr.bf16.mxu0 %v1175_v21  ;;  %v4507_v21 = vld [vmem:[%s5613_s1 + $0x230] sm:$0xff]  }
  0x78   : > { %4144 = vmatprep.mubr.bf16.mxu1 %v1326_v20  ;;  %v4506_v20 = vld [vmem:[%s5613_s1 + $0x238] sm:$0xff]  }
  0x79   : > { %4111 = vmatpush3.bf16.msra.mxu0 %v4496_v59 }
  0x7a   : > { %4135 = vmatpush3.bf16.msra.mxu1 %v4497_v61  ;;  %4112 = vmatprep.subr.bf16.mxu0 %v4498_v62 }
  0x7b   : > { %4136 = vmatprep.subr.bf16.mxu1 %v4499_v3 }
  0x7d   : > { %4113 = vmatpush3.bf16.msra.mxu0 %v4498_v62 }
  0x7e   : > { %4137 = vmatpush3.bf16.msra.mxu1 %v4499_v3  ;;  %4114 = vmatprep.subr.bf16.mxu0 %v4500_v6 }
  0x7f   : > { %4138 = vmatprep.subr.bf16.mxu1 %v4501_v7 }
  0x81   : > { %4115 = vmatpush3.bf16.msra.mxu0 %v4500_v6 }
  0x82   : > { %4139 = vmatpush3.bf16.msra.mxu1 %v4501_v7  ;;  %4116 = vmatprep.subr.bf16.mxu0 %v4502_v16 }
  0x83   : > { %4140 = vmatprep.subr.bf16.mxu1 %v4503_v19 }
  0x85   : > { %4117 = vmatpush3.bf16.msra.mxu0 %v4502_v16 }
  0x86   : > { %4141 = vmatpush3.bf16.msra.mxu1 %v4503_v19  ;;  %4118 = vmatprep.subr.bf16.mxu0 %v4504_v12 }
  0x87   : > { %4142 = vmatprep.subr.bf16.mxu1 %v4505_v17 }
  0x89   : > { %4119 = vmatpush3.bf16.msra.mxu0 %v4504_v12 }
  0x8a   : > { %4143 = vmatpush3.bf16.msra.mxu1 %v4505_v17  ;;  %4152 = vmatprep.subr.bf16.mxu0 %v4506_v20 }
  0x8b   : > { %4176 = vmatprep.subr.bf16.mxu1 %v4514_v38 }
  0x8c   : > { %4121 = vmatmul.mubr.bf16.vlgmr.msra.gmra.mxu0 %v1176_v34  ;;  %v1329_v34 = vpack.c.bf16 %v3453_v10, %v4783_v47  ;;  %v4517_v47 = vld [vmem:[%s5615_s3 + $0x30] sm:$0xff]  }
  0x8d   : > { %4153 = vmatpush3.bf16.msra.mxu0 %v4506_v20  ;;  %4145 = vmatmul.mubr.bf16.vlgmr.msra.gmra.mxu1 %v1327_v32  ;;  %v4512_v32 = vld [vmem:[%s5613_s1 + $0x208] sm:$0xff]  }
  0x8e   : > { %4154 = vmatprep.subr.bf16.mxu0 %v4507_v21  ;;  %4124 = vmatprep.mubr.bf16.mxu0 %v1177_v40  ;;  %v4515_v40 = vld [vmem:[%s5615_s3 + $0x38] sm:$0xff]  }
  0x8f   : > { %4148 = vmatprep.mubr.bf16.mxu1 %v1328_v41  ;;  %4177 = vmatpush3.bf16.msra.mxu1 %v4514_v38  ;;  %v4516_v41 = vld [vmem:[%s5615_s3 + $0x70] sm:$0xff]  }
  0x90   : > { %4178 = vmatprep.subr.bf16.mxu1 %v4516_v41 }
  0x91   : > { %4155 = vmatpush3.bf16.msra.mxu0 %v4507_v21 }
  0x92   : > { %4156 = vmatprep.subr.bf16.mxu0 %v4508_v9 }
  0x93   : > { %4179 = vmatpush3.bf16.msra.mxu1 %v4516_v41 }
  0x94   : > { %4125 = vmatmul.mubr.bf16.gmra.mxu0 %v1178_v27  ;;  %4180 = vmatprep.subr.bf16.mxu1 %v4518_v48 }
  0x95   : > { %4157 = vmatpush3.bf16.msra.mxu0 %v4508_v9  ;;  %4149 = vmatmul.mubr.bf16.gmra.mxu1 %v1329_v34 }
  0x96   : > { %4158 = vmatprep.subr.bf16.mxu0 %v4509_v31  ;;  %4168 = vmatprep.mubr.bf16.mxu0 %v1476_v56  ;;  %v4522_v56 = vld [vmem:[%s5615_s3 + $0x58] sm:$0xff]  }
  0x97   : > { %4181 = vmatpush3.bf16.msra.mxu1 %v4518_v48 }
  0x98   : > { %4182 = vmatprep.subr.bf16.mxu1 %v4520_v53 }
  0x99   : > { %4159 = vmatpush3.bf16.msra.mxu0 %v4509_v31 }
  0x9a   : > { %4160 = vmatprep.subr.bf16.mxu0 %v4510_v26 }
  0x9b   : > { %4183 = vmatpush3.bf16.msra.mxu1 %v4520_v53 }
  0x9c   : > { %4184 = vmatprep.subr.bf16.mxu1 %v4522_v56 }
  0x9d   : > { %4161 = vmatpush3.bf16.msra.mxu0 %v4510_v26 }
  0x9e   : > { %4162 = vmatprep.subr.bf16.mxu0 %v4511_v28 }
  0x9f   : > { %4185 = vmatpush3.bf16.msra.mxu1 %v4522_v56 }
  0xa0   : > { %4186 = vmatprep.subr.bf16.mxu1 %v4524_v0 }
  0xa1   : > { %4163 = vmatpush3.bf16.msra.mxu0 %v4511_v28 }
  0xa2   : > { %4164 = vmatprep.subr.bf16.mxu0 %v4512_v32 }
  0xa3   : > { %4187 = vmatpush3.bf16.msra.mxu1 %v4524_v0 }
  0xa5   : > { %4165 = vmatpush3.bf16.msra.mxu0 %v4512_v32 }
  0xa6   : > { %4166 = vmatprep.subr.bf16.mxu0 %v4513_v33 }
  0xa9   : > { %4167 = vmatpush3.bf16.msra.mxu0 %v4513_v33 }
  0xaa   : > { %4200 = vmatprep.subr.bf16.mxu0 %v4515_v40 }
  0xac   : > { %4169 = vmatmul.mubr.bf16.vlgmr.msra.gmra.mxu0 %v1477_v4  ;;  %v4526_v4 = vld [vmem:[%s5615_s3 + $0x48] sm:$0xff]  }
  0xad   : > { %4172 = vmatprep.mubr.bf16.mxu0 %v1478_v5  ;;  %4201 = vmatpush3.bf16.msra.mxu0 %v4515_v40  ;;  %v4525_v5 = vld [vmem:[%s5615_s3 + $0x10] sm:$0xff]  }
  0xae   : > { %4202 = vmatprep.subr.bf16.mxu0 %v4517_v47  ;;  %4188 = vmatprep.subr.bf16.mxu1 %v4526_v4 }
  0xaf   : > { %4189 = vmatpush3.bf16.msra.mxu1 %v4526_v4 }
  0xb0   : > { %4190 = vmatprep.subr.bf16.mxu1 %v4528_v39 }
  0xb1   : > { %4203 = vmatpush3.bf16.msra.mxu0 %v4517_v47 }
  0xb2   : > { %4204 = vmatprep.subr.bf16.mxu0 %v4519_v52 }
  0xb3   : > { %4191 = vmatpush3.bf16.msra.mxu1 %v4528_v39 }
  0xb4   : > { %4173 = vmatmul.mubr.bf16.gmra.mxu0 %v1479_v37  ;;  %4224 = vmatprep.subr.bf16.mxu1 %v5107_v14 }
  0xb5   : > { %4205 = vmatpush3.bf16.msra.mxu0 %v4519_v52 }
  0xb6   : > { %4206 = vmatprep.subr.bf16.mxu0 %v4521_v63 }
  0xb9   : > { %4207 = vmatpush3.bf16.msra.mxu0 %v4521_v63 }
  0xba   : > { %4208 = vmatprep.subr.bf16.mxu0 %v4523_v2 }
  0xbd   : > { %4209 = vmatpush3.bf16.msra.mxu0 %v4523_v2 }
  0xbe   : > { %4210 = vmatprep.subr.bf16.mxu0 %v4525_v5 }
  0xc1   : > { %4211 = vmatpush3.bf16.msra.mxu0 %v4525_v5 }
  0xc2   : > { %4212 = vmatprep.subr.bf16.mxu0 %v4527_v13 }
  0xc5   : > { %4213 = vmatpush3.bf16.msra.mxu0 %v4527_v13 }
  0xc6   : > { %4214 = vmatprep.subr.bf16.mxu0 %v4529_v18 }
  0xc9   : > { %4215 = vmatpush3.bf16.msra.mxu0 %v4529_v18 }
  0xca   : > { %4248 = vmatprep.subr.bf16.mxu0 %v5116_v24 }
  0xec   : > { %v5099_v11 = vpop.f32.mrf.mxu0 }
  0xed   : > { %v4002_v23 = vpop.f32.mrf.mxu1 }
  0xee   : > { %v420_v15 = vpop.f32.mrf.mxu0  ;;  %v542_v53 = vadd.f32 %v4002_v23, %v5099_v11 }
  0xef   : > { %v533_v30 = vpop.f32.mrf.mxu1 }
  0xf0   : > { %v3979_v22 = vpop.f32.mrf.mxu0  ;;  %v534_v0 = vadd.f32 %v533_v30, %v420_v15 }
  0xf1   : > { %v4003_v42 = vpop.f32.mrf.mxu1 }
  0xf2   : > { %v423_v25 = vpop.f32.mrf.mxu0  ;;  %v545_v4 = vadd.f32 %v4003_v42, %v3979_v22 }
  0xf3   : > { %v536_v44 = vpop.f32.mrf.mxu1 }
  0xf4   : > { %v3982_v29 = vpop.f32.mrf.mxu0  ;;  %v537_v18 = vadd.f32 %v536_v44, %v423_v25 }
  0xf5   : > { %v4006_v45 = vpop.f32.mrf.mxu1 }
  0xf6   : > { %v436_v35 = vpop.f32.mrf.mxu0  ;;  %v558_v14 = vadd.f32 %v4006_v45, %v3982_v29 }
  0xf7   : > { %v549_v50 = vpop.f32.mrf.mxu1 }
  0xf8   : > { %v5119_v43 = vpop.f32.mrf.mxu0 }
  0xf9   : > { %5626 = vst [vmem:[#allocation5_spill] sm:$0xff] %v5119_v43  ;;  %v4007_v54 = vpop.f32.mrf.mxu1  ;;  %v550_v43 = vadd.f32 %v549_v50, %v436_v35 }
  0xfa   : > { %v5121_v46 = vpop.f32.mrf.mxu0 }
  0xfb   : > { %5627 = vst [vmem:[#allocation6_spill] sm:$0xff] %v5121_v46  ;;  %v552_v57 = vpop.f32.mrf.mxu1 }
 0x100   : > { %v5632_v30 = vld [vmem:[#allocation5_spill] sm:$0xff] }
 0x102   : > { %v5633_v25 = vld [vmem:[#allocation6_spill] sm:$0xff] }
 0x103   : > { %v553_v44 = vadd.f32 %v552_v57, %v5633_v25 }
 0x10c   : > { %v4026_v49 = vpop.f32.mrf.mxu0 }
 0x10d   : > { %v4050_v58 = vpop.f32.mrf.mxu1  ;;  %v708_v2 = vadd.f32 %v4026_v49, %v542_v53  ;;  %v561_v49 = vadd.f32 %v4007_v54, %v5632_v30 }
 0x10e   : > { %v675_v51 = vpop.f32.mrf.mxu0 }
 0x10f   : > { %v826_v60 = vpop.f32.mrf.mxu1  ;;  %v706_v5 = vadd.f32 %v675_v51, %v534_v0  ;;  %v859_v1 = vadd.f32 %v4050_v58, %v708_v2 }
 0x110   : > { %v4027_v55 = vpop.f32.mrf.mxu0 }
 0x111   : > { %v4051_v62 = vpop.f32.mrf.mxu1  ;;  %v709_v24 = vadd.f32 %v4027_v55, %v545_v4 }
 0x112   : > { %v678_v59 = vpop.f32.mrf.mxu0 }
 0x113   : > { %v829_v6 = vpop.f32.mrf.mxu1  ;;  %v860_v11 = vadd.f32 %v4051_v62, %v709_v24 }
 0x114   : > { %v4030_v61 = vpop.f32.mrf.mxu0 }
 0x115   : > { %v4054_v16 = vpop.f32.mrf.mxu1  ;;  %v712_v23 = vadd.f32 %v4030_v61, %v558_v14 }
 0x116   : > { %v691_v3 = vpop.f32.mrf.mxu0 }
 0x117   : > { %v842_v17 = vpop.f32.mrf.mxu1  ;;  %v710_v53 = vadd.f32 %v691_v3, %v550_v43  ;;  %v863_v45 = vadd.f32 %v4054_v16, %v712_v23  ;;  %v5138_v16 = vld [vmem:[%s5614_s2] ss:$0 sm:$0xff] }
 0x118   : > { %v4031_v7 = vpop.f32.mrf.mxu0 }
 0x119   : > { %v4055_v21 = vpop.f32.mrf.mxu1  ;;  %v713_v55 = vadd.f32 %v4031_v7, %v561_v49  ;;  %v861_v35 = vadd.f32 %v842_v17, %v710_v53 }
 0x11a   : > { %v694_v19 = vpop.f32.mrf.mxu0 }
 0x11b   : > { %v5123_v9 = vpop.f32.mrf.mxu1  ;;  %v711_v50 = vadd.f32 %v694_v19, %v553_v44  ;;  %v864_v54 = vadd.f32 %v4055_v21, %v713_v55 }
 0x11c   : > { %5628 = vst [vmem:[#allocation7_spill] sm:$0xff] %v5123_v9  ;;  %v707_v9 = vadd.f32 %v678_v59, %v537_v18 }
 0x11e   : > { %v858_v22 = vadd.f32 %v829_v6, %v707_v9 }
 0x12c   : > { %v4074_v12 = vpop.f32.mrf.mxu0 }
 0x12d   : > { %v4098_v10 = vpop.f32.mrf.mxu1 }
 0x12e   : > { %v977_v20 = vpop.f32.mrf.mxu0 }
 0x12f   : > { %v1127_v31 = vpop.f32.mrf.mxu1 }
 0x130   : > { %v4075_v8 = vpop.f32.mrf.mxu0 }
 0x131   : > { %v4099_v26 = vpop.f32.mrf.mxu1  ;;  %v1011_v51 = vadd.f32 %v4075_v8, %v860_v11 }
 0x132   : > { %v980_v27 = vpop.f32.mrf.mxu0 }
 0x133   : > { %v1130_v32 = vpop.f32.mrf.mxu1  ;;  %v1161_v24 = vadd.f32 %v4099_v26, %v1011_v51 }
 0x134   : > { %v4078_v34 = vpop.f32.mrf.mxu0 }
 0x135   : > { %v4102_v36 = vpop.f32.mrf.mxu1  ;;  %v1014_v14 = vadd.f32 %v4078_v34, %v863_v45 }
 0x136   : > { %v993_v28 = vpop.f32.mrf.mxu0 }
 0x137   : > { %v1143_v40 = vpop.f32.mrf.mxu1  ;;  %v1012_v43 = vadd.f32 %v993_v28, %v861_v35  ;;  %v1164_v19 = vadd.f32 %v4102_v36, %v1014_v14 }
 0x138   : > { %v4079_v33 = vpop.f32.mrf.mxu0 }
 0x139   : > { %v5127_v47 = vpop.f32.mrf.mxu1  ;;  %v1015_v7 = vadd.f32 %v4079_v33, %v864_v54  ;;  %v1162_v21 = vadd.f32 %v1143_v40, %v1012_v43 }
 0x13a   : > { %v5125_v37 = vpop.f32.mrf.mxu0  ;;  %5630 = vst [vmem:[#allocation9_spill] sm:$0xff] %v5127_v47  ;;  %v1010_v47 = vadd.f32 %v4074_v12, %v859_v1  ;;  %v1009_v1 = vadd.f32 %v980_v27, %v858_v22 }
 0x13b   : > { %5629 = vst [vmem:[#allocation8_spill] sm:$0xff] %v5125_v37  ;;  %v5129_v52 = vpop.f32.mrf.mxu1  ;;  %v857_v37 = vadd.f32 %v826_v60, %v706_v5 }
 0x13c   : > { %5631 = vst [vmem:[#allocation10_spill] sm:$0xff] %v5129_v52  ;;  %v1160_v42 = vadd.f32 %v4098_v10, %v1010_v47  ;;  %v1159_v3 = vadd.f32 %v1130_v32, %v1009_v1 }
 0x13d   : > { %v1008_v15 = vadd.f32 %v977_v20, %v857_v37  ;;  %v5634_v20 = vld [vmem:[#allocation7_spill] sm:$0xff] }
 0x13e   : > { %v862_v57 = vadd.f32 %v5634_v20, %v711_v50 }
 0x13f   : > { %v1158_v58 = vadd.f32 %v1127_v31, %v1008_v15 }
 0x142   : > { %v5635_v31 = vld [vmem:[#allocation8_spill] sm:$0xff] }
 0x143   : > { %v1013_v34 = vadd.f32 %v5635_v31, %v862_v57  ;;  %v5637_v40 = vld [vmem:[#allocation10_spill] sm:$0xff]  ;;  %v5639_v57 = vmov 0.0  }
 0x145   : > { %v1163_v5 = vadd.f32 %v5637_v40, %v1013_v34  ;;  %v4533_v34 = vld [vmem:[%s5615_s3 + $0xf0] sm:$0xff]  }
 0x14c   : > { %v4122_v38 = vpop.f32.mrf.mxu0 }
 0x14d   : > { %v4146_v56 = vpop.f32.mrf.mxu1  ;;  %v1311_v59 = vadd.f32 %v4122_v38, %v1160_v42  ;;  %v5636_v38 = vld [vmem:[#allocation9_spill] sm:$0xff] }
 0x14e   : > { %v1278_v41 = vpop.f32.mrf.mxu0 }
 0x14f   : > { %v1429_v39 = vpop.f32.mrf.mxu1  ;;  %v1309_v60 = vadd.f32 %v1278_v41, %v1158_v58  ;;  %v1462_v6 = vadd.f32 %v4146_v56, %v1311_v59  ;;  %v1165_v41 = vadd.f32 %v5636_v38, %v1015_v7 }
 0x150   : > { %v4123_v48 = vpop.f32.mrf.mxu0 }
 0x151   : > { %v4147_v46 = vpop.f32.mrf.mxu1  ;;  %v1312_v12 = vadd.f32 %v4123_v48, %v1161_v24  ;;  %v1460_v17 = vadd.f32 %v1429_v39, %v1309_v60  ;;  %v4532_v60 = vld [vmem:[%s5615_s3 + $0xb0] sm:$0xff]  }
 0x152   : > { %v1281_v63 = vpop.f32.mrf.mxu0 }
 0x153   : > { %v1432_v0 = vpop.f32.mrf.mxu1  ;;  %v1310_v9 = vadd.f32 %v1281_v63, %v1159_v3  ;;  %v1463_v28 = vadd.f32 %v4147_v46, %v1312_v12  ;;  %v1698_v46 = vld [vmem:[#allocation2 + $0x1] sm:$0xff] }
 0x154   : > { %v4126_v13 = vpop.f32.mrf.mxu0 }
 0x155   : > { %v4150_v61 = vpop.f32.mrf.mxu1  ;;  %v1315_v32 = vadd.f32 %v4126_v13, %v1164_v19  ;;  %v1461_v56 = vadd.f32 %v1432_v0, %v1310_v9  ;;  %v4534_v19 = vld [vmem:[%s5615_s3 + $0xa8] sm:$0xff]  }
 0x156   : > { %v1294_v52 = vpop.f32.mrf.mxu0  ;;  %v1953_v9 = vld [vmem:[#allocation2 + $0x2] sm:$0xff] }
 0x157   : > { %v1445_v10 = vpop.f32.mrf.mxu1  ;;  %v1313_v47 = vadd.f32 %v1294_v52, %v1162_v21  ;;  %v1466_v13 = vadd.f32 %v4150_v61, %v1315_v32 }
 0x158   : > { %v4127_v29 = vpop.f32.mrf.mxu0 }
 0x159   : > { %v4151_v2 = vpop.f32.mrf.mxu1  ;;  %v1316_v39 = vadd.f32 %v4127_v29, %v1165_v41  ;;  %v1464_v15 = vadd.f32 %v1445_v10, %v1313_v47  ;;  %v4535_v47 = vld [vmem:[%s5615_s3 + $0xe8] sm:$0xff]  }
 0x15a   : > { %v1297_v62 = vpop.f32.mrf.mxu0 }
 0x15b   : > { %v1314_v30 = vadd.f32 %v1297_v62, %v1163_v5  ;;  %v1448_v53 = vpop.f32.mrf.mxu1  ;;  %v1467_v25 = vadd.f32 %v4151_v2, %v1316_v39  ;;  %v4540_v5 = vld [vmem:[%s5615_s3 + $0x90] sm:$0xff]   ;;  %v4539_v39 = vld [vmem:[%s5615_s3 + $0xd8] sm:$0xff]  }
 0x15d   : > { %v1465_v1 = vadd.f32 %v1448_v53, %v1314_v30 }
 0x16c   : > { %v4170_v8 = vpop.f32.mrf.mxu0 }
 0x16d   : > { %v1612_v27 = vadd.f32 %v4170_v8, %v1462_v6  ;;  %v5638_v6 = vld [vmem:[#allocation3_spill] sm:$0xff] }
 0x16e   : > { %v1579_v26 = vpop.f32.mrf.mxu0 }
 0x16f   : > { %v1627_v37 = vadd.f32 %v5138_v16, %v1612_v27  ;;  %v1610_v33 = vadd.f32 %v1579_v26, %v1460_v17 }
 0x170   : > { %v4171_v48 = vpop.f32.mrf.mxu0 }
 0x171   : > { %v5143_v36 = vmax.f32 %v1627_v37, 0.0  ;;  %v1625_v63 = vadd.f32 %v5138_v16, %v1610_v33  ;;  %v1613_v4 = vadd.f32 %v4171_v48, %v1463_v28  ;;  %v4536_v28 = vld [vmem:[%s5615_s3 + $0xa0] sm:$0xff]   ;;  %v5640_v37 = vld [vmem:[#allocation4_spill] sm:$0xff]  ;;  %v4538_v48 = vld [vmem:[%s5615_s3 + $0x98] sm:$0xff]  }
 0x172   : > { %v1582_v18 = vpop.f32.mrf.mxu0 }
 0x173   : > { %1664 = vst [vmem:[#allocation2 + $0x31] sm:$0xff] %v5143_v36  ;;  %v5148_v11 = vmax.f32 %v1625_v63, 0.0  ;;  %v1628_v52 = vadd.f32 %v5138_v16, %v1613_v4  ;;  %v1611_v23 = vadd.f32 %v1582_v18, %v1461_v56  ;;  %v4537_v4 = vld [vmem:[%s5615_s3 + $0xe0] sm:$0xff]   ;;  %v4542_v18 = vld [vmem:[%s5615_s3 + $0x88] sm:$0xff]  }
 0x174   : > { %v4174_v49 = vpop.f32.mrf.mxu0 }
 0x175   : > { %1662 = vst [vmem:[#allocation2 + $0x11] sm:$0xff] %v5148_v11  ;;  %v5152_v22 = vmax.f32 %v1628_v52, 0.0  ;;  %v1626_v42 = vadd.f32 %v5138_v16, %v1611_v23  ;;  %v1616_v51 = vadd.f32 %v4174_v49, %v1466_v13  ;;  %v1706_v0 = vpack.c.bf16 %v5148_v11, %v1698_v46  ;;  %v4541_v46 = vld [vmem:[%s5615_s3 + $0xd0] sm:$0xff]   ;;  %v4544_v13 = vld [vmem:[%s5615_s3 + $0x80] sm:$0xff]   ;;  %v4543_v52 = vld [vmem:[%s5615_s3 + $0xc8] sm:$0xff]  }
 0x176   : > { %v1595_v44 = vpop.f32.mrf.mxu0  ;;  %v4546_v23 = vld [vmem:[%s5615_s3 + $0x138] sm:$0xff]   ;;  %v4545_v49 = vld [vmem:[%s5615_s3 + $0xc0] sm:$0xff]  }
 0x177   : > { %1665 = vst [vmem:[#allocation2 + $0x41] sm:$0xff] %v5152_v22  ;;  %v5157_v55 = vmax.f32 %v1626_v42, 0.0  ;;  %v1631_v29 = vadd.f32 %v5138_v16, %v1616_v51  ;;  %v1614_v45 = vadd.f32 %v1595_v44, %v1464_v15  ;;  %4192 = vmatprep.mubr.bf16.mxu1 %v1706_v0  ;;  %v2262_v58 = vpack.c.bf16 %v5152_v22, %v5143_v36  ;;  %v4547_v44 = vld [vmem:[%s5615_s3 + $0x178] sm:$0xff]  }
 0x178   : > { %v4175_v59 = vpop.f32.mrf.mxu0 }
 0x179   : > { %1663 = vst [vmem:[#allocation2 + $0x21] sm:$0xff] %v5157_v55  ;;  %v5163_v35 = vmax.f32 %v1631_v29, 0.0  ;;  %v1629_v50 = vadd.f32 %v5138_v16, %v1614_v45  ;;  %v1617_v24 = vadd.f32 %v4175_v59, %v1467_v25  ;;  %v5168_v14 = vpack.c.bf16 %v5143_v36, %v5157_v55  ;;  %v4548_v25 = vld [vmem:[%s5615_s3 + $0x130] sm:$0xff]   ;;  %v4550_v29 = vld [vmem:[%s5615_s3 + $0x128] sm:$0xff]  }
 0x17a   : > { %v1598_v61 = vpop.f32.mrf.mxu0  ;;  %v5197_v27 = vld [vmem:[#allocation2 + $0x30] sm:$0xff] }
 0x17b   : > { %1668 = vst [vmem:[#allocation2 + $0x71] sm:$0xff] %v5163_v35  ;;  %v5174_v54 = vmax.f32 %v1629_v50, 0.0  ;;  %v1632_v43 = vadd.f32 %v5138_v16, %v1617_v24  ;;  %v1615_v62 = vadd.f32 %v1598_v61, %v1465_v1  ;;  %4193 = vmatmul.mubr.bf16.vlgmr.msra.gmra.mxu1 %v5168_v14  ;;  %v5269_v53 = vld [vmem:[#allocation2 + $0x32] sm:$0xff]  ;;  %v4552_v61 = vld [vmem:[%s5615_s3 + $0x120] sm:$0xff]  }
 0x17c   : > { %v1671_v3 = vld [vmem:[#allocation2 + $0x10] sm:$0xff]  ;;  %4225 = vmatpush3.bf16.msra.mxu1 %v5638_v6  ;;  %v4554_v6 = vld [vmem:[%s5615_s3 + $0x118] sm:$0xff]  }
 0x17d   : > { %1666 = vst [vmem:[#allocation2 + $0x51] sm:$0xff] %v5174_v54  ;;  %v5180_v12 = vmax.f32 %v1632_v43, 0.0  ;;  %v1630_v20 = vadd.f32 %v5138_v16, %v1615_v62  ;;  %v1678_v7 = vpack.c.bf16 %v1671_v3, %v5639_v57  ;;  %4226 = vmatprep.subr.bf16.mxu1 %v4532_v60  ;;  %v5186_v8 = vpack.c.bf16 %v5174_v54, %v5152_v22  ;;  %v5199_v21 = vld [vmem:[#allocation2 + $0x12] sm:$0xff]  ;;  %v4551_v62 = vld [vmem:[%s5615_s3 + $0x168] sm:$0xff]  }
 0x17e   : > { %v1961_v32 = vpack.c.bf16 %v5199_v21, %v1953_v9  ;;  %v5219_v33 = vld [vmem:[#allocation2 + $0x40] sm:$0xff]  ;;  %v4549_v59 = vld [vmem:[%s5615_s3 + $0x170] sm:$0xff]   ;;  %v2261_v43 = vpack.c.bf16 %v5157_v55, %v5148_v11  ;;  %v4558_v9 = vld [vmem:[%s5615_s3 + $0x108] sm:$0xff]  }
 0x17f   : > { %1669 = vst [vmem:[#allocation2 + $0x81] sm:$0xff] %v5180_v12  ;;  %v5192_v17 = vmax.f32 %v1630_v20, 0.0  ;;  %4216 = vmatprep.mubr.bf16.mxu0 %v1678_v7  ;;  %4196 = vmatprep.mubr.bf16.mxu1 %v5186_v8  ;;  %v2264_v16 = vpack.c.bf16 %v5180_v12, %v5163_v35  ;;  %v5274_v51 = vld [vmem:[#allocation2 + $0x42] sm:$0xff]  ;;  %v2112_v1 = vpack.c.bf16 %v5219_v33, %v5197_v27  ;;  %v4556_v7 = vld [vmem:[%s5615_s3 + $0x110] sm:$0xff]  }
 0x180   : > { %v1672_v10 = vld [vmem:[#allocation2 + $0x20] sm:$0xff]  ;;  %4227 = vmatpush3.bf16.msra.mxu1 %v4532_v60  ;;  %v4565_v36 = vld [vmem:[%s5615_s3 + $0x1f0] sm:$0xff]  }
 0x181   : > { %1667 = vst [vmem:[#allocation2 + $0x61] sm:$0xff] %v5192_v17  ;;  %v5203_v31 = vpack.c.bf16 %v5197_v27, %v1672_v10  ;;  %4228 = vmatprep.subr.bf16.mxu1 %v4534_v19  ;;  %v5210_v26 = vpack.c.bf16 %v5163_v35, %v5192_v17  ;;  %v2111_v40 = vpack.c.bf16 %v1672_v10, %v1671_v3  ;;  %v1955_v15 = vld [vmem:[#allocation2 + $0x22] sm:$0xff]  ;;  %v4557_v10 = vld [vmem:[%s5615_s3 + $0x150] sm:$0xff]  }
 0x182   : > { %v5234_v2 = vld [vmem:[#allocation2 + $0x70] sm:$0xff]  ;;  %v5272_v42 = vpack.c.bf16 %v5269_v53, %v1955_v15  ;;  %v4553_v55 = vld [vmem:[%s5615_s3 + $0x160] sm:$0xff]   ;;  %v2411_v20 = vpack.c.bf16 %v1955_v15, %v5199_v21  ;;  %v4559_v21 = vld [vmem:[%s5615_s3 + $0x148] sm:$0xff]  }
 0x183   : > { %4217 = vmatmul.mubr.bf16.vlgmr.msra.gmra.mxu0 %v5203_v31  ;;  %4197 = vmatmul.mubr.bf16.gmra.mxu1 %v5210_v26  ;;  %v5299_v24 = vld [vmem:[#allocation2 + $0x72] sm:$0xff]  ;;  %v4560_v27 = vld [vmem:[%s5615_s3 + $0x100] sm:$0xff]  }
 0x184   : > { %4249 = vmatpush3.bf16.msra.mxu0 %v5640_v37  ;;  %v5221_v38 = vld [vmem:[#allocation2 + $0x50] sm:$0xff]  ;;  %4229 = vmatpush3.bf16.msra.mxu1 %v4534_v19  ;;  %v4555_v19 = vld [vmem:[%s5615_s3 + $0x158] sm:$0xff]   ;;  %v2263_v37 = vpack.c.bf16 %v5192_v17, %v5174_v54  ;;  %v2412_v54 = vpack.c.bf16 %v5274_v51, %v5269_v53  ;;  %v4567_v17 = vld [vmem:[%s5615_s3 + $0x1e8] sm:$0xff]  }
 0x185   : > { %4250 = vmatprep.subr.bf16.mxu0 %v4533_v34  ;;  %v5225_v41 = vpack.c.bf16 %v5221_v38, %v5219_v33  ;;  %4240 = vmatprep.mubr.bf16.mxu1 %v1961_v32  ;;  %v5264_v30 = vld [vmem:[#allocation2 + $0x52] sm:$0xff]  ;;  %v4569_v35 = vld [vmem:[%s5615_s3 + $0x1e0] sm:$0xff]  }
 0x186   : > { %4230 = vmatprep.subr.bf16.mxu1 %v4536_v28  ;;  %v5278_v0 = vpack.c.bf16 %v5264_v30, %v5274_v51  ;;  %v5314_v3 = vld [vmem:[#allocation2 + $0x80] sm:$0xff]  ;;  %v4564_v32 = vld [vmem:[%s5615_s3 + $0x1b0] sm:$0xff]   ;;  %v4563_v33 = vld [vmem:[%s5615_s3 + $0x1f8] sm:$0xff]  }
 0x187   : > { %4220 = vmatprep.mubr.bf16.mxu0 %v5225_v41  ;;  %v2114_v11 = vpack.c.bf16 %v5314_v3, %v5234_v2  ;;  %v3712_v15 = vld [vmem:[%s4687_s28 + $0x1b0] sm:$0xff]  ;;  %v4585_v53 = vld [vmem:[%s5617_s5 + $0x20] sm:$0xff]   ;;  %v4587_v51 = vld [vmem:[%s5617_s5 + $0x18] sm:$0xff]  }
 0x188   : > { %4251 = vmatpush3.bf16.msra.mxu0 %v4533_v34  ;;  %v1676_v56 = vld [vmem:[#allocation2 + $0x60] sm:$0xff]  ;;  %4231 = vmatpush3.bf16.msra.mxu1 %v4536_v28  ;;  %v4562_v34 = vld [vmem:[%s5615_s3 + $0x1b8] sm:$0xff]  }
 0x189   : > { %4252 = vmatprep.subr.bf16.mxu0 %v4535_v47  ;;  %v5237_v63 = vpack.c.bf16 %v5234_v2, %v1676_v56  ;;  %4232 = vmatprep.subr.bf16.mxu1 %v4538_v48  ;;  %v5291_v45 = vld [vmem:[#allocation2 + $0x62] sm:$0xff]  ;;  %v2113_v50 = vpack.c.bf16 %v1676_v56, %v5221_v38 }
 0x18a   : > { %v5303_v60 = vpack.c.bf16 %v5299_v24, %v5291_v45  ;;  %v4561_v28 = vld [vmem:[%s5615_s3 + $0x140] sm:$0xff]   ;;  %v4566_v38 = vld [vmem:[%s5615_s3 + $0x1a8] sm:$0xff]   ;;  %v2413_v22 = vpack.c.bf16 %v5291_v45, %v5264_v30 }
 0x18b   : > { %4221 = vmatmul.mubr.bf16.gmra.mxu0 %v5237_v63  ;;  %v4574_v2 = vld [vmem:[%s5615_s3 + $0x188] sm:$0xff]   ;;  %v3713_v30 = vld [vmem:[%s4687_s28 + $0x1c0] sm:$0xff] }
 0x18c   : > { %4253 = vmatpush3.bf16.msra.mxu0 %v4535_v47  ;;  %4264 = vmatprep.mubr.bf16.mxu0 %v2111_v40  ;;  %v5379_v47 = vld [vmem:[#allocation2 + $0x82] sm:$0xff] }
 0x18d   : > { %4254 = vmatprep.subr.bf16.mxu0 %v4537_v4  ;;  %4233 = vmatpush3.bf16.msra.mxu1 %v4538_v48  ;;  %v4570_v48 = vld [vmem:[%s5615_s3 + $0x198] sm:$0xff]   ;;  %v2414_v56 = vpack.c.bf16 %v5379_v47, %v5299_v24  ;;  %v4575_v40 = vld [vmem:[%s5615_s3 + $0x1c8] sm:$0xff]   ;;  %v4593_v45 = vld [vmem:[%s5617_s5] sm:$0xff]  }
 0x18e   : > { %4234 = vmatprep.subr.bf16.mxu1 %v4540_v5  ;;  %v3716_v24 = vld [vmem:[%s4687_s28 + $0x1f0] sm:$0xff] }
 0x190   : > { %4255 = vmatpush3.bf16.msra.mxu0 %v4537_v4  ;;  %v4573_v4 = vld [vmem:[%s5615_s3 + $0x1d0] sm:$0xff]  }
 0x191   : > { %4256 = vmatprep.subr.bf16.mxu0 %v4539_v39  ;;  %4235 = vmatpush3.bf16.msra.mxu1 %v4540_v5  ;;  %v4578_v5 = vld [vmem:[%s5615_s3 + $0x238] sm:$0xff]  }
 0x192   : > { %4236 = vmatprep.subr.bf16.mxu1 %v4542_v18 }
 0x194   : > { %4257 = vmatpush3.bf16.msra.mxu0 %v4539_v39  ;;  %v4577_v39 = vld [vmem:[%s5615_s3 + $0x1c0] sm:$0xff]  }
 0x195   : > { %4258 = vmatprep.subr.bf16.mxu0 %v4541_v46  ;;  %4237 = vmatpush3.bf16.msra.mxu1 %v4542_v18  ;;  %v4580_v18 = vld [vmem:[%s5615_s3 + $0x230] sm:$0xff]  }
 0x196   : > { %4238 = vmatprep.subr.bf16.mxu1 %v4544_v13 }
 0x198   : > { %4259 = vmatpush3.bf16.msra.mxu0 %v4541_v46  ;;  %v4579_v46 = vld [vmem:[%s5617_s5 + $0x38] sm:$0xff]  }
 0x199   : > { %4260 = vmatprep.subr.bf16.mxu0 %v4543_v52  ;;  %4239 = vmatpush3.bf16.msra.mxu1 %v4544_v13  ;;  %v4582_v13 = vld [vmem:[%s5615_s3 + $0x228] sm:$0xff]  }
 0x19a   : > { %4272 = vmatprep.subr.bf16.mxu1 %v4546_v23 }
 0x19c   : > { %4261 = vmatpush3.bf16.msra.mxu0 %v4543_v52  ;;  %4241 = vmatmul.mubr.bf16.vlgmr.msra.gmra.mxu1 %v5272_v42  ;;  %v4584_v52 = vld [vmem:[%s5615_s3 + $0x220] sm:$0xff]  }
 0x19d   : > { %4262 = vmatprep.subr.bf16.mxu0 %v4545_v49  ;;  %4244 = vmatprep.mubr.bf16.mxu1 %v5278_v0 }
 0x19e   : > { %4273 = vmatpush3.bf16.msra.mxu1 %v4546_v23  ;;  %v4583_v23 = vld [vmem:[%s5617_s5 + $0x28] sm:$0xff]  }
 0x19f   : > { %4274 = vmatprep.subr.bf16.mxu1 %v4548_v25 }
 0x1a0   : > { %4263 = vmatpush3.bf16.msra.mxu0 %v4545_v49 }
 0x1a1   : > { %4296 = vmatprep.subr.bf16.mxu0 %v4547_v44 }
 0x1a2   : > { %4275 = vmatpush3.bf16.msra.mxu1 %v4548_v25  ;;  %v4589_v25 = vld [vmem:[%s5617_s5 + $0x10] sm:$0xff]  }
 0x1a3   : > { %4265 = vmatmul.mubr.bf16.vlgmr.msra.gmra.mxu0 %v2112_v1  ;;  %4276 = vmatprep.subr.bf16.mxu1 %v4550_v29  ;;  %v3714_v1 = vld [vmem:[%s4687_s28 + $0x1d0] sm:$0xff] }
 0x1a4   : > { %4268 = vmatprep.mubr.bf16.mxu0 %v2113_v50  ;;  %4297 = vmatpush3.bf16.msra.mxu0 %v4547_v44  ;;  %v4592_v44 = vld [vmem:[%s5615_s3 + $0x200] sm:$0xff]  }
 0x1a5   : > { %4298 = vmatprep.subr.bf16.mxu0 %v4549_v59  ;;  %4245 = vmatmul.mubr.bf16.gmra.mxu1 %v5303_v60 }
 0x1a6   : > { %4277 = vmatpush3.bf16.msra.mxu1 %v4550_v29  ;;  %4288 = vmatprep.mubr.bf16.mxu1 %v2261_v43  ;;  %v4591_v29 = vld [vmem:[%s5617_s5 + $0x8] sm:$0xff]   ;;  %v2861_v43 = vld [vmem:[#allocation2 + $0x92] sm:$0xff] }
 0x1a7   : > { %4278 = vmatprep.subr.bf16.mxu1 %v4552_v61 }
 0x1a8   : > { %4299 = vmatpush3.bf16.msra.mxu0 %v4549_v59  ;;  %v3715_v59 = vld [vmem:[%s4687_s28 + $0x1e0] sm:$0xff] }
 0x1a9   : > { %4300 = vmatprep.subr.bf16.mxu0 %v4551_v62  ;;  %v3028_v50 = vpack.c.bf16 %v3715_v59, %v3714_v1 }
 0x1aa   : > { %4279 = vmatpush3.bf16.msra.mxu1 %v4552_v61  ;;  %v3717_v61 = vld [vmem:[%s4687_s28 + $0x200] sm:$0xff] }
 0x1ab   : > { %4269 = vmatmul.mubr.bf16.gmra.mxu0 %v2114_v11  ;;  %4280 = vmatprep.subr.bf16.mxu1 %v4554_v6 }
 0x1ac   : > { %4301 = vmatpush3.bf16.msra.mxu0 %v4551_v62  ;;  %4312 = vmatprep.mubr.bf16.mxu0 %v2411_v20  ;;  %v3029_v62 = vpack.c.bf16 %v3717_v61, %v3716_v24 }
 0x1ad   : > { %4302 = vmatprep.subr.bf16.mxu0 %v4553_v55 }
 0x1ae   : > { %4281 = vmatpush3.bf16.msra.mxu1 %v4554_v6 }
 0x1af   : > { %4282 = vmatprep.subr.bf16.mxu1 %v4556_v7 }
 0x1b0   : > { %4303 = vmatpush3.bf16.msra.mxu0 %v4553_v55 }
 0x1b1   : > { %4304 = vmatprep.subr.bf16.mxu0 %v4555_v19 }
 0x1b2   : > { %4283 = vmatpush3.bf16.msra.mxu1 %v4556_v7 }
 0x1b3   : > { %4284 = vmatprep.subr.bf16.mxu1 %v4558_v9 }
 0x1b4   : > { %4305 = vmatpush3.bf16.msra.mxu0 %v4555_v19 }
 0x1b5   : > { %4306 = vmatprep.subr.bf16.mxu0 %v4557_v10 }
 0x1b6   : > { %4285 = vmatpush3.bf16.msra.mxu1 %v4558_v9 }
 0x1b7   : > { %4286 = vmatprep.subr.bf16.mxu1 %v4560_v27 }
 0x1b8   : > { %4307 = vmatpush3.bf16.msra.mxu0 %v4557_v10 }
 0x1b9   : > { %4308 = vmatprep.subr.bf16.mxu0 %v4559_v21 }
 0x1ba   : > { %4287 = vmatpush3.bf16.msra.mxu1 %v4560_v27 }
 0x1bb   : > { %4320 = vmatprep.subr.bf16.mxu1 %v4562_v34 }
 0x1bc   : > { %4309 = vmatpush3.bf16.msra.mxu0 %v4559_v21 }
 0x1bd   : > { %4310 = vmatprep.subr.bf16.mxu0 %v4561_v28  ;;  %4289 = vmatmul.mubr.bf16.vlgmr.msra.gmra.mxu1 %v2262_v58  ;;  %v4568_v58 = vld [vmem:[%s5615_s3 + $0x1a0] sm:$0xff]  }
 0x1be   : > { %4292 = vmatprep.mubr.bf16.mxu1 %v2263_v37  ;;  %4321 = vmatpush3.bf16.msra.mxu1 %v4562_v34 }
 0x1bf   : > { %4322 = vmatprep.subr.bf16.mxu1 %v4564_v32 }
 0x1c0   : > { %4311 = vmatpush3.bf16.msra.mxu0 %v4561_v28 }
 0x1c1   : > { %4344 = vmatprep.subr.bf16.mxu0 %v4563_v33 }
 0x1c2   : > { %4323 = vmatpush3.bf16.msra.mxu1 %v4564_v32 }
 0x1c3   : > { %4313 = vmatmul.mubr.bf16.vlgmr.msra.gmra.mxu0 %v2412_v54  ;;  %4324 = vmatprep.subr.bf16.mxu1 %v4566_v38 }
 0x1c4   : > { %4316 = vmatprep.mubr.bf16.mxu0 %v2413_v22  ;;  %4345 = vmatpush3.bf16.msra.mxu0 %v4563_v33 }
 0x1c5   : > { %4346 = vmatprep.subr.bf16.mxu0 %v4565_v36  ;;  %4293 = vmatmul.mubr.bf16.gmra.mxu1 %v2264_v16  ;;  %v4572_v16 = vld [vmem:[%s5615_s3 + $0x190] sm:$0xff]  }
 0x1c6   : > { %4325 = vmatpush3.bf16.msra.mxu1 %v4566_v38  ;;  %4336 = vmatprep.mubr.bf16.mxu1 %v5203_v31  ;;  %v4571_v31 = vld [vmem:[%s5615_s3 + $0x1d8] sm:$0xff]  }
 0x1c7   : > { %4326 = vmatprep.subr.bf16.mxu1 %v4568_v58 }
 0x1c8   : > { %4347 = vmatpush3.bf16.msra.mxu0 %v4565_v36 }
 0x1c9   : > { %4348 = vmatprep.subr.bf16.mxu0 %v4567_v17 }
 0x1ca   : > { %4327 = vmatpush3.bf16.msra.mxu1 %v4568_v58 }
 0x1cb   : > { %4317 = vmatmul.mubr.bf16.gmra.mxu0 %v2414_v56  ;;  %4328 = vmatprep.subr.bf16.mxu1 %v4570_v48 }
 0x1cc   : > { %4349 = vmatpush3.bf16.msra.mxu0 %v4567_v17  ;;  %4360 = vmatprep.mubr.bf16.mxu0 %v5168_v14  ;;  %v4576_v14 = vld [vmem:[%s5615_s3 + $0x180] sm:$0xff]  }
 0x1cd   : > { %4350 = vmatprep.subr.bf16.mxu0 %v4569_v35 }
 0x1ce   : > { %4329 = vmatpush3.bf16.msra.mxu1 %v4570_v48 }
 0x1cf   : > { %4330 = vmatprep.subr.bf16.mxu1 %v4572_v16 }
 0x1d0   : > { %4351 = vmatpush3.bf16.msra.mxu0 %v4569_v35 }
 0x1d1   : > { %4352 = vmatprep.subr.bf16.mxu0 %v4571_v31 }
 0x1d2   : > { %4331 = vmatpush3.bf16.msra.mxu1 %v4572_v16 }
 0x1d3   : > { %4332 = vmatprep.subr.bf16.mxu1 %v4574_v2 }
 0x1d4   : > { %4353 = vmatpush3.bf16.msra.mxu0 %v4571_v31 }
 0x1d5   : > { %4354 = vmatprep.subr.bf16.mxu0 %v4573_v4 }
 0x1d6   : > { %4333 = vmatpush3.bf16.msra.mxu1 %v4574_v2 }
 0x1d7   : > { %4334 = vmatprep.subr.bf16.mxu1 %v4576_v14 }
 0x1d8   : > { %4355 = vmatpush3.bf16.msra.mxu0 %v4573_v4 }
 0x1d9   : > { %4356 = vmatprep.subr.bf16.mxu0 %v4575_v40 }
 0x1da   : > { %4335 = vmatpush3.bf16.msra.mxu1 %v4576_v14 }
 0x1db   : > { %4368 = vmatprep.subr.bf16.mxu1 %v4578_v5 }
 0x1dc   : > { %4357 = vmatpush3.bf16.msra.mxu0 %v4575_v40 }
 0x1dd   : > { %4358 = vmatprep.subr.bf16.mxu0 %v4577_v39  ;;  %4337 = vmatmul.mubr.bf16.vlgmr.msra.gmra.mxu1 %v5225_v41  ;;  %v4581_v41 = vld [vmem:[%s5617_s5 + $0x30] sm:$0xff]  }
 0x1de   : > { %4340 = vmatprep.mubr.bf16.mxu1 %v5237_v63  ;;  %4369 = vmatpush3.bf16.msra.mxu1 %v4578_v5  ;;  %v2565_v63 = vpack.c.bf16 %v5639_v57, %v5314_v3  ;;  %v4586_v57 = vld [vmem:[%s5615_s3 + $0x218] sm:$0xff]   ;;  %v2865_v3 = vpack.c.bf16 %v2861_v43, %v5379_v47 }
 0x1df   : > { %4370 = vmatprep.subr.bf16.mxu1 %v4580_v18 }
 0x1e0   : > { %4359 = vmatpush3.bf16.msra.mxu0 %v4577_v39 }
 0x1e1   : > { %4392 = vmatprep.subr.bf16.mxu0 %v4579_v46 }
 0x1e2   : > { %4371 = vmatpush3.bf16.msra.mxu1 %v4580_v18 }
 0x1e3   : > { %4361 = vmatmul.mubr.bf16.vlgmr.msra.gmra.mxu0 %v5186_v8  ;;  %4372 = vmatprep.subr.bf16.mxu1 %v4582_v13  ;;  %v2711_v8 = vld [vmem:[#allocation2 + $0x91] sm:$0xff] }
 0x1e4   : > { %4364 = vmatprep.mubr.bf16.mxu0 %v5210_v26  ;;  %4393 = vmatpush3.bf16.msra.mxu0 %v4579_v46  ;;  %v3027_v26 = vpack.c.bf16 %v3713_v30, %v3712_v15  ;;  %v2715_v49 = vpack.c.bf16 %v2711_v8, %v5180_v12  ;;  %v4590_v12 = vld [vmem:[%s5615_s3 + $0x208] sm:$0xff]  }
 0x1e5   : > { %4394 = vmatprep.subr.bf16.mxu0 %v4581_v41  ;;  %4341 = vmatmul.mubr.bf16.gmra.mxu1 %v2565_v63 }
 0x1e6   : > { %4373 = vmatpush3.bf16.msra.mxu1 %v4582_v13  ;;  %4384 = vmatprep.mubr.bf16.mxu1 %v5272_v42  ;;  %v4588_v42 = vld [vmem:[%s5615_s3 + $0x210] sm:$0xff]  }
 0x1e7   : > { %4374 = vmatprep.subr.bf16.mxu1 %v4584_v52 }
 0x1e8   : > { %4395 = vmatpush3.bf16.msra.mxu0 %v4581_v41 }
 0x1e9   : > { %4396 = vmatprep.subr.bf16.mxu0 %v4583_v23 }
 0x1ea   : > { %4375 = vmatpush3.bf16.msra.mxu1 %v4584_v52 }
 0x1eb   : > { %4365 = vmatmul.mubr.bf16.gmra.mxu0 %v2715_v49  ;;  %4376 = vmatprep.subr.bf16.mxu1 %v4586_v57 }
 0x1ec   : > { %4397 = vmatpush3.bf16.msra.mxu0 %v4583_v23  ;;  %4408 = vmatprep.mubr.bf16.mxu0 %v3027_v26 }
 0x1ed   : > { %4398 = vmatprep.subr.bf16.mxu0 %v4585_v53 }
 0x1ee   : > { %4377 = vmatpush3.bf16.msra.mxu1 %v4586_v57 }
 0x1ef   : > { %4378 = vmatprep.subr.bf16.mxu1 %v4588_v42 }
 0x1f0   : > { %4399 = vmatpush3.bf16.msra.mxu0 %v4585_v53 }
 0x1f1   : > { %4400 = vmatprep.subr.bf16.mxu0 %v4587_v51 }
 0x1f2   : > { %4379 = vmatpush3.bf16.msra.mxu1 %v4588_v42 }
 0x1f3   : > { %4380 = vmatprep.subr.bf16.mxu1 %v4590_v12 }
 0x1f4   : > { %4401 = vmatpush3.bf16.msra.mxu0 %v4587_v51 }
 0x1f5   : > { %4402 = vmatprep.subr.bf16.mxu0 %v4589_v25 }
 0x1f6   : > { %4381 = vmatpush3.bf16.msra.mxu1 %v4590_v12 }
 0x1f7   : > { %4382 = vmatprep.subr.bf16.mxu1 %v4592_v44 }
 0x1f8   : > { %4403 = vmatpush3.bf16.msra.mxu0 %v4589_v25 }
 0x1f9   : > { %4404 = vmatprep.subr.bf16.mxu0 %v4591_v29 }
 0x1fa   : > { %4383 = vmatpush3.bf16.msra.mxu1 %v4592_v44 }
 0x1fb   : > { %4416 = vmatprep.subr.bf16.mxu1 %v4579_v46 }
 0x1fc   : > { %4405 = vmatpush3.bf16.msra.mxu0 %v4591_v29 }
 0x1fd   : > { %4406 = vmatprep.subr.bf16.mxu0 %v4593_v45  ;;  %4385 = vmatmul.mubr.bf16.vlgmr.msra.gmra.mxu1 %v5278_v0  ;;  %v3718_v0 = vld [vmem:[%s4687_s28 + $0x210] sm:$0xff] }
 0x1fe   : > { %4388 = vmatprep.mubr.bf16.mxu1 %v5303_v60  ;;  %4424 = vmatpush3.bf16.msra.mxu1 %v4579_v46  ;;  %v3719_v60 = vld [vmem:[%s4687_s28 + $0x220] sm:$0xff] }
 0x1ff   : > { %4417 = vmatprep.subr.bf16.mxu1 %v4581_v41  ;;  %v3030_v6 = vpack.c.bf16 %v3719_v60, %v3718_v0 }
 0x200   : > { %4407 = vmatpush3.bf16.msra.mxu0 %v4593_v45 }
 0x202   : > { %4425 = vmatpush3.bf16.msra.mxu1 %v4581_v41 }
 0x203   : > { %4409 = vmatmul.mubr.bf16.vlgmr.msra.gmra.mxu0 %v3028_v50  ;;  %4418 = vmatprep.subr.bf16.mxu1 %v4583_v23 }
 0x205   : > { %4389 = vmatmul.mubr.bf16.gmra.mxu1 %v2865_v3 }
 0x206   : > { %4426 = vmatpush3.bf16.msra.mxu1 %v4583_v23  ;;  %4412 = vmatprep.mubr.bf16.mxu1 %v3029_v62 }
 0x207   : > { %4419 = vmatprep.subr.bf16.mxu1 %v4585_v53 }
 0x20a   : > { %4427 = vmatpush3.bf16.msra.mxu1 %v4585_v53 }
 0x20b   : > { %4420 = vmatprep.subr.bf16.mxu1 %v4587_v51 }
 0x20e   : > { %4428 = vmatpush3.bf16.msra.mxu1 %v4587_v51 }
 0x20f   : > { %4421 = vmatprep.subr.bf16.mxu1 %v4589_v25 }
 0x212   : > { %4429 = vmatpush3.bf16.msra.mxu1 %v4589_v25 }
 0x213   : > { %4422 = vmatprep.subr.bf16.mxu1 %v4591_v29 }
 0x216   : > { %4430 = vmatpush3.bf16.msra.mxu1 %v4591_v29 }
 0x217   : > { %4423 = vmatprep.subr.bf16.mxu1 %v4593_v45 }
 0x21a   : > { %4431 = vmatpush3.bf16.msra.mxu1 %v4593_v45 }
 0x21d   : > { %4413 = vmatmul.mubr.bf16.vlgmr.msra.gmra.mxu1 %v3030_v6 }
 0x23b   : > { %v4194_v11 = vpop.f32.mrf.mxu1 }
 0x23d   : > { %v1809_v55 = vpop.f32.mrf.mxu1 }
 0x23f   : > { %v5479_v20 = vpop.f32.mrf.mxu1 }
 0x241   : > { %v5481_v7 = vpop.f32.mrf.mxu1 }
 0x243   : > { %v4218_v19 = vpop.f32.mrf.mxu0  ;;  %v4198_v10 = vpop.f32.mrf.mxu1 }
 0x244   : > { %v1931_v0 = vadd.f32 %v4218_v19, %v4194_v11 }
 0x245   : > { %v1922_v9 = vpop.f32.mrf.mxu0  ;;  %v1825_v34 = vpop.f32.mrf.mxu1 }
 0x246   : > { %v1923_v6 = vadd.f32 %v1922_v9, %v1809_v55 }
 0x247   : > { %v4219_v27 = vpop.f32.mrf.mxu0  ;;  %v4199_v33 = vpop.f32.mrf.mxu1 }
 0x249   : > { %v1925_v21 = vpop.f32.mrf.mxu0  ;;  %v1828_v22 = vpop.f32.mrf.mxu1 }
 0x24b   : > { %v4222_v28 = vpop.f32.mrf.mxu0 }
 0x24c   : > { %v5483_v32 = vadd.f32 %v4222_v28, %v4198_v10  ;;  %v1934_v28 = vadd.f32 %v4219_v27, %v5479_v20 }
 0x24d   : > { %v1938_v37 = vpop.f32.mrf.mxu0 }
 0x24e   : > { %v5485_v38 = vadd.f32 %v1938_v37, %v1825_v34 }
 0x24f   : > { %v4223_v54 = vpop.f32.mrf.mxu0 }
 0x250   : > { %v5487_v36 = vadd.f32 %v4223_v54, %v4199_v33 }
 0x251   : > { %v1941_v58 = vpop.f32.mrf.mxu0 }
 0x252   : > { %v5489_v17 = vadd.f32 %v1941_v58, %v1828_v22  ;;  %v1926_v22 = vadd.f32 %v1925_v21, %v5481_v7 }
 0x25c   : > { %v4242_v47 = vpop.f32.mrf.mxu1 }
 0x25d   : > { %v2097_v10 = vadd.f32 %v4242_v47, %v1931_v0 }
 0x25e   : > { %v2064_v48 = vpop.f32.mrf.mxu1 }
 0x25f   : > { %v2095_v33 = vadd.f32 %v2064_v48, %v1923_v6 }
 0x260   : > { %v4243_v35 = vpop.f32.mrf.mxu1 }
 0x262   : > { %v2067_v31 = vpop.f32.mrf.mxu1 }
 0x263   : > { %v4266_v56 = vpop.f32.mrf.mxu0  ;;  %v2096_v19 = vadd.f32 %v2067_v31, %v1926_v22 }
 0x264   : > { %v2247_v37 = vadd.f32 %v4266_v56, %v2097_v10 }
 0x265   : > { %v2214_v16 = vpop.f32.mrf.mxu0  ;;  %v5491_v4 = vpop.f32.mrf.mxu1 }
 0x266   : > { %v2245_v58 = vadd.f32 %v2214_v16, %v2095_v33 }
 0x267   : > { %v4267_v2 = vpop.f32.mrf.mxu0  ;;  %v5493_v40 = vpop.f32.mrf.mxu1 }
 0x269   : > { %v2217_v14 = vpop.f32.mrf.mxu0  ;;  %v5497_v39 = vpop.f32.mrf.mxu1 }
 0x26a   : > { %v2246_v47 = vadd.f32 %v2217_v14, %v2096_v19  ;;  %v5544_v14 = vld [vmem:[%s5616_s4] ss:$0 sm:$0xff] }
 0x26b   : > { %v5495_v5 = vpop.f32.mrf.mxu0  ;;  %v5501_v46 = vpop.f32.mrf.mxu1 }
 0x26d   : > { %v5499_v18 = vpop.f32.mrf.mxu0 }
 0x26f   : > { %v5503_v13 = vpop.f32.mrf.mxu0 }
 0x271   : > { %v5505_v63 = vpop.f32.mrf.mxu0 }
 0x27d   : > { %v4290_v41 = vpop.f32.mrf.mxu1 }
 0x27f   : > { %v2364_v52 = vpop.f32.mrf.mxu1 }
 0x280   : > { %v2395_v55 = vadd.f32 %v2364_v52, %v2245_v58 }
 0x281   : > { %v4291_v15 = vpop.f32.mrf.mxu1 }
 0x283   : > { %v4314_v23 = vpop.f32.mrf.mxu0  ;;  %v2367_v8 = vpop.f32.mrf.mxu1 }
 0x284   : > { %v2396_v7 = vadd.f32 %v2367_v8, %v2246_v47 }
 0x285   : > { %v2514_v30 = vpop.f32.mrf.mxu0  ;;  %v5507_v26 = vpop.f32.mrf.mxu1 }
 0x286   : > { %v2545_v0 = vadd.f32 %v2514_v30, %v2395_v55 }
 0x287   : > { %v4315_v57 = vpop.f32.mrf.mxu0  ;;  %v5509_v53 = vpop.f32.mrf.mxu1 }
 0x289   : > { %v2517_v49 = vpop.f32.mrf.mxu0  ;;  %v5513_v51 = vpop.f32.mrf.mxu1 }
 0x28b   : > { %v5511_v42 = vpop.f32.mrf.mxu0  ;;  %v5517_v25 = vpop.f32.mrf.mxu1 }
 0x28c   : > { %5641 = vst [vmem:[#allocation5_spill] sm:$0xff] %v5517_v25  ;;  %v2397_v25 = vadd.f32 %v4290_v41, %v2247_v37  ;;  %v2546_v41 = vadd.f32 %v2517_v49, %v2396_v7 }
 0x28d   : > { %v5515_v12 = vpop.f32.mrf.mxu0 }
 0x28f   : > { %v5519_v44 = vpop.f32.mrf.mxu0 }
 0x290   : > { %5642 = vst [vmem:[#allocation6_spill] sm:$0xff] %v5519_v44 }
 0x291   : > { %v5521_v45 = vpop.f32.mrf.mxu0 }
 0x292   : > { %5643 = vst [vmem:[#allocation7_spill] sm:$0xff] %v5521_v45  ;;  %v2098_v45 = vadd.f32 %v4243_v35, %v1934_v28 }
 0x294   : > { %v2248_v11 = vadd.f32 %v4267_v2, %v2098_v45 }
 0x296   : > { %v2398_v20 = vadd.f32 %v4291_v15, %v2248_v11  ;;  %v5549_v15 = vld [vmem:[%s5618_s6] ss:$0 sm:$0xff] }
 0x298   : > { %v2548_v6 = vadd.f32 %v4315_v57, %v2398_v20 }
 0x29d   : > { %v4338_v29 = vpop.f32.mrf.mxu1 }
 0x29f   : > { %v2665_v1 = vpop.f32.mrf.mxu1 }
 0x2a0   : > { %v2696_v35 = vadd.f32 %v2665_v1, %v2545_v0 }
 0x2a1   : > { %v4339_v50 = vpop.f32.mrf.mxu1 }
 0x2a2   : > { %v2699_v31 = vadd.f32 %v4339_v50, %v2548_v6 }
 0x2a3   : > { %v4362_v59 = vpop.f32.mrf.mxu0  ;;  %v2668_v61 = vpop.f32.mrf.mxu1 }
 0x2a4   : > { %v2697_v57 = vadd.f32 %v2668_v61, %v2546_v41 }
 0x2a5   : > { %v2815_v24 = vpop.f32.mrf.mxu0  ;;  %v5523_v62 = vpop.f32.mrf.mxu1 }
 0x2a6   : > { %v2846_v2 = vadd.f32 %v2815_v24, %v2696_v35 }
 0x2a7   : > { %v4363_v43 = vpop.f32.mrf.mxu0  ;;  %v5525_v60 = vpop.f32.mrf.mxu1 }
 0x2a8   : > { %5644 = vst [vmem:[#allocation8_spill] sm:$0xff] %v5525_v60  ;;  %v2547_v60 = vadd.f32 %v4314_v23, %v2397_v25  ;;  %v2849_v8 = vadd.f32 %v4363_v43, %v2699_v31 }
 0x2a9   : > { %v2818_v3 = vpop.f32.mrf.mxu0  ;;  %v5530_v54 = vpop.f32.mrf.mxu1 }
 0x2aa   : > { %v2698_v27 = vadd.f32 %v4338_v29, %v2547_v60  ;;  %v2847_v45 = vadd.f32 %v2818_v3, %v2697_v57 }
 0x2ab   : > { %v5527_v34 = vpop.f32.mrf.mxu0  ;;  %v5535_v9 = vpop.f32.mrf.mxu1 }
 0x2ac   : > { %v2848_v21 = vadd.f32 %v4362_v59, %v2698_v27  ;;  %v2101_v27 = vadd.f32 %v5491_v4, %v5483_v32  ;;  %v2100_v32 = vadd.f32 %v5501_v46, %v5489_v17 }
 0x2ad   : > { %v5533_v44 = vpop.f32.mrf.mxu0 }
 0x2ae   : > { %v2251_v7 = vadd.f32 %v5495_v5, %v2101_v27 }
 0x2af   : > { %v5537_v48 = vpop.f32.mrf.mxu0  ;;  %v5647_v17 = vld [vmem:[#allocation8_spill] sm:$0xff] }
 0x2b0   : > { %v2401_v41 = vadd.f32 %v5507_v26, %v2251_v7  ;;  %v5645_v26 = vld [vmem:[#allocation6_spill] sm:$0xff] }
 0x2b1   : > { %v5539_v52 = vpop.f32.mrf.mxu0 }
 0x2b2   : > { %v2551_v4 = vadd.f32 %v5511_v42, %v2401_v41  ;;  %v5648_v42 = vld [vmem:[#allocation7_spill] sm:$0xff] }
 0x2bd   : > { %v4386_v56 = vpop.f32.mrf.mxu1 }
 0x2be   : > { %v2998_v23 = vadd.f32 %v4386_v56, %v2848_v21  ;;  %v2099_v21 = vadd.f32 %v5493_v40, %v5485_v38  ;;  %v2250_v38 = vadd.f32 %v5505_v63, %v2100_v32 }
 0x2bf   : > { %v2965_v16 = vpop.f32.mrf.mxu1 }
 0x2c0   : > { %v2996_v25 = vadd.f32 %v2965_v16, %v2846_v2  ;;  %v3013_v1 = vadd.f32 %v5544_v14, %v2998_v23  ;;  %v2249_v35 = vadd.f32 %v5499_v18, %v2099_v21  ;;  %v2102_v16 = vadd.f32 %v5497_v39, %v5487_v36 }
 0x2c1   : > { %v4387_v30 = vpop.f32.mrf.mxu1  ;;  %v2702_v36 = vadd.f32 %v5523_v62, %v2551_v4 }
 0x2c2   : > { %v2999_v50 = vadd.f32 %v4387_v30, %v2849_v8  ;;  %v3011_v60 = vadd.f32 %v5544_v14, %v2996_v25  ;;  %v2252_v31 = vadd.f32 %v5503_v13, %v2102_v16  ;;  %v2399_v5 = vadd.f32 %v5509_v53, %v2249_v35  ;;  %v5646_v30 = vld [vmem:[#allocation5_spill] sm:$0xff] }
 0x2c3   : > { %v4410_v49 = vpop.f32.mrf.mxu0  ;;  %v2968_v29 = vpop.f32.mrf.mxu1  ;;  %v2400_v13 = vadd.f32 %v5646_v30, %v2250_v38  ;;  %v2852_v8 = vadd.f32 %v5527_v34, %v2702_v36 }
 0x2c4   : > { %v3145_v59 = vadd.f32 %v4410_v49, %v5549_v15  ;;  %v2997_v37 = vadd.f32 %v2968_v29, %v2847_v45  ;;  %v3014_v3 = vadd.f32 %v5544_v14, %v2999_v50  ;;  %v2549_v40 = vadd.f32 %v5515_v12, %v2399_v5 }
 0x2c5   : > { %v3136_v24 = vpop.f32.mrf.mxu0  ;;  %v4390_v6 = vpop.f32.mrf.mxu1  ;;  %v2402_v18 = vadd.f32 %v5513_v51, %v2252_v31  ;;  %v2550_v57 = vadd.f32 %v5648_v42, %v2400_v13 }
 0x2c6   : > { %v3169_v10 = vadd.f32 %v3145_v59, %v3013_v1  ;;  %v3137_v28 = vadd.f32 %v5549_v15, %v3136_v24  ;;  %v3012_v19 = vadd.f32 %v5544_v14, %v2997_v37  ;;  %v2700_v46 = vadd.f32 %v5647_v17, %v2549_v40 }
 0x2c7   : > { %v4411_v61 = vpop.f32.mrf.mxu0  ;;  %v2981_v2 = vpop.f32.mrf.mxu1  ;;  %v2552_v23 = vadd.f32 %v5645_v26, %v2402_v18  ;;  %v3002_v12 = vadd.f32 %v4390_v6, %v2852_v8  ;;  %v2701_v62 = vadd.f32 %v5535_v9, %v2550_v57 }
 0x2c8   : > { %v3177_v43 = vmax.f32 %v3169_v10, 0.0  ;;  %v3167_v33 = vadd.f32 %v3137_v28, %v3011_v60  ;;  %v3148_v22 = vadd.f32 %v4411_v61, %v5549_v15  ;;  %v2850_v53 = vadd.f32 %v5533_v44, %v2700_v46 }
 0x2c9   : > { %v3139_v58 = vpop.f32.mrf.mxu0  ;;  %v4391_v39 = vpop.f32.mrf.mxu1  ;;  %v2703_v63 = vadd.f32 %v5530_v54, %v2552_v23  ;;  %v2851_v45 = vadd.f32 %v5539_v52, %v2701_v62  ;;  %v3017_v34 = vadd.f32 %v5544_v14, %v3002_v12 }
 0x2ca   : > { %3185 = vst [vmem:[%s5559_s18 + $0x10] sm:$0xff] %v3177_v43  ;;  %v3175_v11 = vmax.f32 %v3167_v33, 0.0  ;;  %v3170_v55 = vadd.f32 %v3148_v22, %v3014_v3  ;;  %v3140_v47 = vadd.f32 %v5549_v15, %v3139_v58  ;;  %v3000_v49 = vadd.f32 %v2981_v2, %v2850_v53 }
 0x2cb   : > { %v2984_v25 = vpop.f32.mrf.mxu1  ;;  %v2853_v51 = vadd.f32 %v5537_v48, %v2703_v63 }
 0x2cc   : > { %3183 = vst [vmem:[%s5559_s18] sm:$0xff] %v3175_v11  ;;  %v3178_v0 = vmax.f32 %v3170_v55, 0.0  ;;  %v3168_v20 = vadd.f32 %v3140_v47, %v3012_v19  ;;  %v3015_v44 = vadd.f32 %v5544_v14, %v3000_v49  ;;  %v3001_v54 = vadd.f32 %v2984_v25, %v2851_v45 }
 0x2cd   : > { %v3003_v1 = vadd.f32 %v4391_v39, %v2853_v51 }
 0x2ce   : > { %3186 = vst [vmem:[%s5559_s18 + $0x18] sm:$0xff] %v3178_v0  ;;  %v3176_v56 = vmax.f32 %v3168_v20, 0.0  ;;  %v3016_v61 = vadd.f32 %v5544_v14, %v3001_v54 }
 0x2cf   : > { %v3018_v60 = vadd.f32 %v5544_v14, %v3003_v1 }
 0x2d0   : > { %3184 = vst [vmem:[%s5559_s18 + $0x8] sm:$0xff] %v3176_v56 }
 0x2dd   : > { %v4414_v29 = vpop.f32.mrf.mxu1 }
 0x2de   : > { %v3161_v59 = vadd.f32 %v4414_v29, %v5549_v15 }
 0x2df   : > { %v3152_v50 = vpop.f32.mrf.mxu1 }
 0x2e0   : > { %v3173_v24 = vadd.f32 %v3161_v59, %v3017_v34  ;;  %v3153_v48 = vadd.f32 %v5549_v15, %v3152_v50 }
 0x2e1   : > { %v4415_v9 = vpop.f32.mrf.mxu1 }
 0x2e2   : > { %v3181_v52 = vmax.f32 %v3173_v24, 0.0  ;;  %v3171_v10 = vadd.f32 %v3153_v48, %v3015_v44  ;;  %v3164_v28 = vadd.f32 %v4415_v9, %v5549_v15 }
 0x2e3   : > { %v3155_v37 = vpop.f32.mrf.mxu1 }
 0x2e4   : > { %3189 = vst [vmem:[%s5559_s18 + $0x30] sm:$0xff] %v3181_v52  ;;  %v3179_v43 = vmax.f32 %v3171_v10, 0.0  ;;  %v3174_v3 = vadd.f32 %v3164_v28, %v3018_v60  ;;  %v3156_v33 = vadd.f32 %v5549_v15, %v3155_v37 }
 0x2e6   : > { %3187 = vst [vmem:[%s5559_s18 + $0x20] sm:$0xff] %v3179_v43  ;;  %v3182_v22 = vmax.f32 %v3174_v3, 0.0  ;;  %v3172_v58 = vadd.f32 %v3156_v33, %v3016_v61 }
 0x2e8   : > { %3190 = vst [vmem:[%s5559_s18 + $0x38] sm:$0xff] %v3182_v22  ;;  %v3180_v11 = vmax.f32 %v3172_v58, 0.0 }
 0x2ea   : > { %3188 = vst [vmem:[%s5559_s18 + $0x28] sm:$0xff] %v3180_v11 }
 0x2eb PF: > { %s17_s24 = sadd.s32 1, %s4600_s24  }
 0x2ec   : > { %p14_p4 = scmp.ge.s32.totalorder %s17_s24, 4  }
 0x2ee   :  { %16 = sbr.rel (!%p14_p4) target bundleno = 1 (0x1), region = 101 }

</bundles_post_ra>
